<compile_context>
chip_gen: v7x
topology: tpu7x:2x2x1
jax: 0.10.0
libtpu: 0.0.40
codegen_flags: <defaults>
</compile_context>

<pallas_src>
import jax
import jax.numpy as jnp
from jax import lax
from jax.experimental import pallas as pl
from jax.experimental.pallas import tpu as pltpu


# TODO(synk): RunningMeanStdModel observation normalization is not implemented
# (the module's default is normalize_observation=False, which is what we match).


def _round_up(x, m):
    return ((x + m - 1) // m) * m


def _infer_leading_dims(x, dim):
    lead = x.ndim - dim
    assert lead in (0, 1, 2)
    if lead == 2:
        T, B = x.shape[0], x.shape[1]
    else:
        T, B = 1, (x.shape[0] if lead == 1 else 1)
    return lead, T, B, x.shape[lead:]


def _restore_leading_dims(tensors, lead_dim, T, B):
    if lead_dim == 2:
        return tuple(t.reshape((T, B) + t.shape[1:]) for t in tensors)
    if lead_dim == 0:
        return tuple(t[0] for t in tensors)
    return tensors


def _pad_gate_cols(w, H, Hp):
    """(n, 4H) -> (n, 4Hp): pad each i/f/g/o block from H to Hp lanes with 0."""
    if Hp == H:
        return w
    n = w.shape[0]
    w4 = jnp.pad(w.reshape(n, 4, H), ((0, 0), (0, 0), (0, Hp - H)))
    return w4.reshape(n, 4 * Hp)


# ----------------------------------------------------------------------------
# Single fused kernel: MLP + gate projection + LSTM recurrence + head.
# ----------------------------------------------------------------------------
def _make_fused_kernel(T, Bp, Hp):
    def kernel(obs_ref, ar_ref, h0_ref, c0_ref,
               w1_ref, b1_ref, w2_ref, b2_ref,
               wim_ref, war_ref, bg_ref,
               whh_ref, whd_ref, bhd_ref,
               out_ref, hn_ref, cn_ref,
               gx_ref, ho_ref):
        # ---- feed-forward: MLP + LSTM input-to-hidden projection (all rows) --
        h = jnp.dot(obs_ref[...], w1_ref[...], preferred_element_type=jnp.float32)
        h = jnp.maximum(h + b1_ref[...], 0.0)
        h = jnp.dot(h, w2_ref[...], preferred_element_type=jnp.float32)
        h = jnp.maximum(h + b2_ref[...], 0.0)
        gx = jnp.dot(h, wim_ref[...], preferred_element_type=jnp.float32)
        gx = gx + jnp.dot(ar_ref[...], war_ref[...],
                          preferred_element_type=jnp.float32)
        gx_ref[...] = gx + bg_ref[...]            # [T*Bp, 4*Hp] gate pre-acts

        # ---- sequential LSTM recurrence (h/c carried in vregs) ---------------
        whh = whh_ref[...]

        def sigmoid(z):                            # exact: EUP tanh, no divide
            return 0.5 * (jnp.tanh(0.5 * z) + 1.0)

        def step(t, carry):
            h_prev, c_prev = carry
            row = pl.multiple_of(t * Bp, 8)
            g = gx_ref[pl.ds(row, Bp), :] + jnp.dot(
                h_prev, whh, preferred_element_type=jnp.float32)
            i_g = sigmoid(g[:, 0 * Hp:1 * Hp])     # PyTorch gate order: i,f,g,o
            f_g = sigmoid(g[:, 1 * Hp:2 * Hp])
            g_g = jnp.tanh(g[:, 2 * Hp:3 * Hp])
            o_g = sigmoid(g[:, 3 * Hp:4 * Hp])
            c_new = f_g * c_prev + i_g * g_g
            h_new = o_g * jnp.tanh(c_new)
            ho_ref[pl.ds(row, Bp), :] = h_new
            return h_new, c_new

        h_fin, c_fin = lax.fori_loop(0, T, step, (h0_ref[...], c0_ref[...]),
                                     unroll=(T <= 8))
        hn_ref[...] = h_fin
        cn_ref[...] = c_fin

        # ---- head: one batch-parallel matmul, off the serial path ------------
        out_ref[...] = (jnp.dot(ho_ref[...], whd_ref[...],
                                preferred_element_type=jnp.float32)
                        + bhd_ref[...])

    return kernel


# ----------------------------------------------------------------------------
# Wrapper.
# ----------------------------------------------------------------------------
def mujoco_lstm_forward(observation, prev_action, prev_reward, init_rnn_state,
                        params, obs_ndim=1):
    lead_dim, T, B, _ = _infer_leading_dims(observation, obs_ndim)

    obs = observation.reshape(T, B, -1).astype(jnp.float32)
    act = prev_action.reshape(T, B, -1).astype(jnp.float32)
    rew = prev_reward.reshape(T, B, 1).astype(jnp.float32)

    obs_dim = obs.shape[-1]
    A = act.shape[-1]
    h1 = params["w1"].shape[1]
    h2 = params["w2"].shape[1]
    H = params["w_hh"].shape[0]
    n_out = 2 * A + 1

    Hp = _round_up(H, 128)              # lane-aligned hidden / per-gate width
    head_pad = _round_up(n_out, 128)    # lane-dense head output
    Bp = _round_up(B, 8)                # sublane-aligned batch rows
    TBp = T * Bp

    if Bp != B:                          # zero-pad batch rows (sliced off later)
        pad = ((0, 0), (0, Bp - B), (0, 0))
        obs = jnp.pad(obs, pad)
        act = jnp.pad(act, pad)
        rew = jnp.pad(rew, pad)
    obs = obs.reshape(TBp, obs_dim)
    act_rew = jnp.concatenate([act, rew], axis=-1).reshape(TBp, A + 1)

    if init_rnn_state is None:
        h0 = jnp.zeros((B, H), jnp.float32)
        c0 = jnp.zeros((B, H), jnp.float32)
    else:
        h0, c0 = init_rnn_state
        h0 = h0.reshape(B, H).astype(jnp.float32)
        c0 = c0.reshape(B, H).astype(jnp.float32)
    h0 = jnp.pad(h0, ((0, Bp - B), (0, Hp - H)))
    c0 = jnp.pad(c0, ((0, Bp - B), (0, Hp - H)))

    # Gate-padded weights: every i/f/g/o block widened from H to Hp lanes.
    w1 = params["w1"].astype(jnp.float32)
    b1 = params["b1"].astype(jnp.float32)
    w2 = params["w2"].astype(jnp.float32)
    b2 = params["b2"].astype(jnp.float32)
    w_ih_mlp = _pad_gate_cols(params["w_ih_mlp"].astype(jnp.float32), H, Hp)
    w_ih_ar = _pad_gate_cols(
        jnp.concatenate([params["w_ih_act"], params["w_ih_rew"]],
                        axis=0).astype(jnp.float32), H, Hp)
    b_gates = _pad_gate_cols(params["b_gates"].astype(jnp.float32), H, Hp)
    w_hh = _pad_gate_cols(
        jnp.pad(params["w_hh"].astype(jnp.float32), ((0, Hp - H), (0, 0))), H, Hp)
    w_head = jnp.pad(params["w_head"].astype(jnp.float32),
                     ((0, Hp - H), (0, head_pad - n_out)))
    b_head = jnp.pad(params["b_head"].astype(jnp.float32),
                     ((0, 0), (0, head_pad - n_out)))

    inputs = (obs, act_rew, h0, c0, w1, b1, w2, b2,
              w_ih_mlp, w_ih_ar, b_gates, w_hh, w_head, b_head)

    def full_spec(a):
        return pl.BlockSpec(a.shape, lambda i: (0, 0))

    in_bytes = 4 * sum(int(a.size) for a in inputs)
    out_bytes = 4 * (TBp * head_pad + 2 * Bp * Hp)
    scratch_bytes = 4 * (TBp * 4 * Hp + TBp * Hp)
    vmem_limit = min(100 * 1024 * 1024,
                     max(32 * 1024 * 1024,
                         2 * (in_bytes + out_bytes + scratch_bytes)))
    flops = (2 * TBp * (obs_dim * h1 + h1 * h2 + (h2 + A + 1) * 4 * Hp)
             + 2 * TBp * Hp * 4 * Hp + 2 * TBp * Hp * head_pad)

    out_pad, hn_p, cn_p = pl.pallas_call(
        _make_fused_kernel(T, Bp, Hp),
        out_shape=(jax.ShapeDtypeStruct((TBp, head_pad), jnp.float32),
                   jax.ShapeDtypeStruct((Bp, Hp), jnp.float32),
                   jax.ShapeDtypeStruct((Bp, Hp), jnp.float32)),
        grid=(1,),
        in_specs=[full_spec(a) for a in inputs],
        out_specs=(pl.BlockSpec((TBp, head_pad), lambda i: (0, 0)),
                   pl.BlockSpec((Bp, Hp), lambda i: (0, 0)),
                   pl.BlockSpec((Bp, Hp), lambda i: (0, 0))),
        scratch_shapes=[pltpu.VMEM((TBp, 4 * Hp), jnp.float32),
                        pltpu.VMEM((TBp, Hp), jnp.float32)],
        compiler_params=pltpu.CompilerParams(
            dimension_semantics=("arbitrary",),
            vmem_limit_bytes=vmem_limit),
        cost_estimate=pl.CostEstimate(
            flops=flops,
            transcendentals=5 * TBp * Hp,
            bytes_accessed=in_bytes + out_bytes),
    )(*inputs)

    outputs = out_pad.reshape(T, Bp, head_pad)[:, :B, :n_out].reshape(T * B, n_out)
    mu = outputs[:, :A]
    log_std = outputs[:, A:-1]
    v = outputs[:, -1]
    mu, log_std, v = _restore_leading_dims((mu, log_std, v), lead_dim, T, B)
    hn = hn_p[:B, :H]
    cn = cn_p[:B, :H]
    return mu, log_std, v, (hn[None], cn[None])   # [1, B, H] like torch.nn.LSTM


# ----------------------------------------------------------------------------
# Params (deterministic, PyTorch-style U(-1/sqrt(fan_in), 1/sqrt(fan_in))).
# Weights are stored [in, out] (transposed from PyTorch) so y = x @ W + b.
# ----------------------------------------------------------------------------
def init_params(key, obs_dim, action_size, hidden_sizes, lstm_size):
    h1, h2 = hidden_sizes
    H, A = lstm_size, action_size

    def lin(k, n_in, n_out):
        k1, k2 = jax.random.split(k)
        bound = 1.0 / (n_in ** 0.5)
        w = jax.random.uniform(k1, (n_in, n_out), jnp.float32, -bound, bound)
        b = jax.random.uniform(k2, (1, n_out), jnp.float32, -bound, bound)
        return w, b

    keys = jax.random.split(key, 7)
    params = {}
    params["w1"], params["b1"] = lin(keys[0], obs_dim, h1)
    params["w2"], params["b2"] = lin(keys[1], h1, h2)

    lstm_in = h2 + A + 1
    bound = 1.0 / (H ** 0.5)
    w_ih = jax.random.uniform(keys[2], (lstm_in, 4 * H), jnp.float32, -bound, bound)
    params["w_ih_mlp"] = w_ih[:h2]
    params["w_ih_act"] = w_ih[h2:h2 + A]
    params["w_ih_rew"] = w_ih[h2 + A:]
    params["w_hh"] = jax.random.uniform(keys[3], (H, 4 * H), jnp.float32, -bound, bound)
    b_ih = jax.random.uniform(keys[4], (1, 4 * H), jnp.float32, -bound, bound)
    b_hh = jax.random.uniform(keys[5], (1, 4 * H), jnp.float32, -bound, bound)
    params["b_gates"] = b_ih + b_hh
    params["w_head"], params["b_head"] = lin(keys[6], H, 2 * A + 1)
    return params


# ----------------------------------------------------------------------------
# Pure-JAX reference for correctness.
# ----------------------------------------------------------------------------
def reference_forward(observation, prev_action, prev_reward, init_rnn_state,
                      params, obs_ndim=1):
    lead_dim, T, B, _ = _infer_leading_dims(observation, obs_ndim)
    TB = T * B
    x = observation.reshape(TB, -1).astype(jnp.float32)
    act = prev_action.reshape(T, B, -1).astype(jnp.float32)
    rew = prev_reward.reshape(T, B, 1).astype(jnp.float32)
    A = act.shape[-1]
    H = params["w_hh"].shape[0]

    h = jnp.maximum(x @ params["w1"] + params["b1"], 0.0)
    h = jnp.maximum(h @ params["w2"] + params["b2"], 0.0)
    lstm_in = jnp.concatenate([h.reshape(T, B, -1), act, rew], axis=2)
    w_ih = jnp.concatenate(
        [params["w_ih_mlp"], params["w_ih_act"], params["w_ih_rew"]], axis=0)

    if init_rnn_state is None:
        h0 = jnp.zeros((B, H), jnp.float32)
        c0 = jnp.zeros((B, H), jnp.float32)
    else:
        h0, c0 = init_rnn_state
        h0 = h0.reshape(B, H).astype(jnp.float32)
        c0 = c0.reshape(B, H).astype(jnp.float32)

    def sigmoid(z):
        return 1.0 / (1.0 + jnp.exp(-z))

    def step(carry, x_t):
        h_prev, c_prev = carry
        gates = x_t @ w_ih + h_prev @ params["w_hh"] + params["b_gates"]
        i_g = sigmoid(gates[:, 0 * H:1 * H])
        f_g = sigmoid(gates[:, 1 * H:2 * H])
        g_g = jnp.tanh(gates[:, 2 * H:3 * H])
        o_g = sigmoid(gates[:, 3 * H:4 * H])
        c_new = f_g * c_prev + i_g * g_g
        h_new = o_g * jnp.tanh(c_new)
        return (h_new, c_new), h_new

    (hn, cn), lstm_out = jax.lax.scan(step, (h0, c0), lstm_in)
    outputs = lstm_out.reshape(TB, H) @ params["w_head"] + params["b_head"]
    mu = outputs[:, :A]
    log_std = outputs[:, A:-1]
    v = outputs[:, -1]
    mu, log_std, v = _restore_leading_dims((mu, log_std, v), lead_dim, T, B)
    return mu, log_std, v, (hn[None], cn[None])


if __name__ == "__main__":
    obs_dim, action_size = 8, 4
    hidden_sizes = [32, 32]
    lstm_size = 32
    T, B = 4, 8

    key = jax.random.PRNGKey(0)
    kp, ko, ka, kr, kh, kc = jax.random.split(key, 6)

    params = init_params(kp, obs_dim, action_size, hidden_sizes, lstm_size)
    observation = jax.random.normal(ko, (T, B, obs_dim), dtype=jnp.float32)
    prev_action = jax.random.normal(ka, (T, B, action_size), dtype=jnp.float32)
    prev_reward = jax.random.normal(kr, (T, B), dtype=jnp.float32)
    h0 = 0.1 * jax.random.normal(kh, (1, B, lstm_size), dtype=jnp.float32)
    c0 = 0.1 * jax.random.normal(kc, (1, B, lstm_size), dtype=jnp.float32)

    mu, log_std, v, (hn, cn) = mujoco_lstm_forward(
        observation, prev_action, prev_reward, (h0, c0), params)
    jax.block_until_ready((mu, log_std, v, hn, cn))

    r_mu, r_ls, r_v, (r_hn, r_cn) = reference_forward(
        observation, prev_action, prev_reward, (h0, c0), params)

    assert mu.shape == (T, B, action_size)
    assert log_std.shape == (T, B, action_size)
    assert v.shape == (T, B)
    assert hn.shape == (1, B, lstm_size) and cn.shape == (1, B, lstm_size)
    for got, want in ((mu, r_mu), (log_std, r_ls), (v, r_v),
                      (hn, r_hn), (cn, r_cn)):
        assert jnp.allclose(got, want, atol=1e-4, rtol=1e-4), \
            float(jnp.max(jnp.abs(got - want)))

    print("KERNEL_OK")
</pallas_src>

<mosaic_0001>
module attributes {stable_mosaic.version = 11 : i64} {
  func.func @kernel(%arg0: i32, %arg1: memref<32x8xf32, #tpu.memory_space<vmem>>, %arg2: memref<32x5xf32, #tpu.memory_space<vmem>>, %arg3: memref<8x128xf32, #tpu.memory_space<vmem>>, %arg4: memref<8x128xf32, #tpu.memory_space<vmem>>, %arg5: memref<8x32xf32, #tpu.memory_space<vmem>>, %arg6: memref<1x32xf32, #tpu.memory_space<vmem>>, %arg7: memref<32x32xf32, #tpu.memory_space<vmem>>, %arg8: memref<1x32xf32, #tpu.memory_space<vmem>>, %arg9: memref<32x512xf32, #tpu.memory_space<vmem>>, %arg10: memref<5x512xf32, #tpu.memory_space<vmem>>, %arg11: memref<1x512xf32, #tpu.memory_space<vmem>>, %arg12: memref<128x512xf32, #tpu.memory_space<vmem>>, %arg13: memref<128x128xf32, #tpu.memory_space<vmem>>, %arg14: memref<1x128xf32, #tpu.memory_space<vmem>>, %arg15: memref<32x128xf32, #tpu.memory_space<vmem>>, %arg16: memref<8x128xf32, #tpu.memory_space<vmem>>, %arg17: memref<8x128xf32, #tpu.memory_space<vmem>>, %arg18: memref<32x512xf32, #tpu.memory_space<vmem>>, %arg19: memref<32x128xf32, #tpu.memory_space<vmem>>) attributes {dimension_semantics = [#tpu.dimension_semantics<arbitrary>], iteration_bounds = array<i64: 1>, scalar_prefetch = 0 : i64, scratch_operands = 2 : i64, tpu.core_type = #tpu.core_type<tc>, window_params = [{pipeline_mode = #tpu.pipeline_mode<synchronous>, transform_indices = @transform_0, window_bounds = array<i64: 32, 8>}, {pipeline_mode = #tpu.pipeline_mode<synchronous>, transform_indices = @transform_1, window_bounds = array<i64: 32, 5>}, {pipeline_mode = #tpu.pipeline_mode<synchronous>, transform_indices = @transform_2, window_bounds = array<i64: 8, 128>}, {pipeline_mode = #tpu.pipeline_mode<synchronous>, transform_indices = @transform_3, window_bounds = array<i64: 8, 128>}, {pipeline_mode = #tpu.pipeline_mode<synchronous>, transform_indices = @transform_4, window_bounds = array<i64: 8, 32>}, {pipeline_mode = #tpu.pipeline_mode<synchronous>, transform_indices = @transform_5, window_bounds = array<i64: 1, 32>}, {pipeline_mode = #tpu.pipeline_mode<synchronous>, transform_indices = @transform_6, window_bounds = array<i64: 32, 32>}, {pipeline_mode = #tpu.pipeline_mode<synchronous>, transform_indices = @transform_7, window_bounds = array<i64: 1, 32>}, {pipeline_mode = #tpu.pipeline_mode<synchronous>, transform_indices = @transform_8, window_bounds = array<i64: 32, 512>}, {pipeline_mode = #tpu.pipeline_mode<synchronous>, transform_indices = @transform_9, window_bounds = array<i64: 5, 512>}, {pipeline_mode = #tpu.pipeline_mode<synchronous>, transform_indices = @transform_10, window_bounds = array<i64: 1, 512>}, {pipeline_mode = #tpu.pipeline_mode<synchronous>, transform_indices = @transform_11, window_bounds = array<i64: 128, 512>}, {pipeline_mode = #tpu.pipeline_mode<synchronous>, transform_indices = @transform_12, window_bounds = array<i64: 128, 128>}, {pipeline_mode = #tpu.pipeline_mode<synchronous>, transform_indices = @transform_13, window_bounds = array<i64: 1, 128>}, {pipeline_mode = #tpu.pipeline_mode<synchronous>, transform_indices = @transform_14, window_bounds = array<i64: 32, 128>}, {pipeline_mode = #tpu.pipeline_mode<synchronous>, transform_indices = @transform_15, window_bounds = array<i64: 8, 128>}, {pipeline_mode = #tpu.pipeline_mode<synchronous>, transform_indices = @transform_16, window_bounds = array<i64: 8, 128>}]} {
    %c0 = arith.constant 0 : index
    %c0_0 = arith.constant 0 : index
    %0 = vector.load %arg1[%c0, %c0_0] : memref<32x8xf32, #tpu.memory_space<vmem>>, vector<32x8xf32>
    %c0_1 = arith.constant 0 : index
    %c0_2 = arith.constant 0 : index
    %1 = vector.load %arg5[%c0_1, %c0_2] : memref<8x32xf32, #tpu.memory_space<vmem>>, vector<8x32xf32>
    %cst = arith.constant dense<0.000000e+00> : vector<32x32xf32>
    %2 = tpu.matmul %0, %1, %cst {dimension_numbers = #tpu.dot_dimension_numbers<[1], [0], [0], [1], [0, 0, 1, 1], [], []>} : vector<32x8xf32>, vector<8x32xf32>, vector<32x32xf32> -> vector<32x32xf32>
    %c0_3 = arith.constant 0 : index
    %c0_4 = arith.constant 0 : index
    %3 = vector.load %arg6[%c0_3, %c0_4] : memref<1x32xf32, #tpu.memory_space<vmem>>, vector<1x32xf32>
    %4 = vector.broadcast %3 : vector<1x32xf32> to vector<32x32xf32>
    %5 = arith.addf %2, %4 : vector<32x32xf32>
    %cst_5 = arith.constant 0.000000e+00 : f32
    %6 = vector.broadcast %cst_5 : f32 to vector<32x32xf32>
    %7 = arith.maximumf %5, %6 : vector<32x32xf32>
    %c0_6 = arith.constant 0 : index
    %c0_7 = arith.constant 0 : index
    %8 = vector.load %arg7[%c0_6, %c0_7] : memref<32x32xf32, #tpu.memory_space<vmem>>, vector<32x32xf32>
    %cst_8 = arith.constant dense<0.000000e+00> : vector<32x32xf32>
    %9 = tpu.matmul %7, %8, %cst_8 {dimension_numbers = #tpu.dot_dimension_numbers<[1], [0], [0], [1], [0, 0, 1, 1], [], []>} : vector<32x32xf32>, vector<32x32xf32>, vector<32x32xf32> -> vector<32x32xf32>
    %c0_9 = arith.constant 0 : index
    %c0_10 = arith.constant 0 : index
    %10 = vector.load %arg8[%c0_9, %c0_10] : memref<1x32xf32, #tpu.memory_space<vmem>>, vector<1x32xf32>
    %11 = vector.broadcast %10 : vector<1x32xf32> to vector<32x32xf32>
    %12 = arith.addf %9, %11 : vector<32x32xf32>
    %cst_11 = arith.constant 0.000000e+00 : f32
    %13 = vector.broadcast %cst_11 : f32 to vector<32x32xf32>
    %14 = arith.maximumf %12, %13 : vector<32x32xf32>
    %c0_12 = arith.constant 0 : index
    %c0_13 = arith.constant 0 : index
    %15 = vector.load %arg9[%c0_12, %c0_13] : memref<32x512xf32, #tpu.memory_space<vmem>>, vector<32x512xf32>
    %cst_14 = arith.constant dense<0.000000e+00> : vector<32x512xf32>
    %16 = tpu.matmul %14, %15, %cst_14 {dimension_numbers = #tpu.dot_dimension_numbers<[1], [0], [0], [1], [0, 0, 1, 1], [], []>} : vector<32x32xf32>, vector<32x512xf32>, vector<32x512xf32> -> vector<32x512xf32>
    %c0_15 = arith.constant 0 : index
    %c0_16 = arith.constant 0 : index
    %17 = vector.load %arg2[%c0_15, %c0_16] : memref<32x5xf32, #tpu.memory_space<vmem>>, vector<32x5xf32>
    %c0_17 = arith.constant 0 : index
    %c0_18 = arith.constant 0 : index
    %18 = vector.load %arg10[%c0_17, %c0_18] : memref<5x512xf32, #tpu.memory_space<vmem>>, vector<5x512xf32>
    %cst_19 = arith.constant dense<0.000000e+00> : vector<32x512xf32>
    %19 = tpu.matmul %17, %18, %cst_19 {dimension_numbers = #tpu.dot_dimension_numbers<[1], [0], [0], [1], [0, 0, 1, 1], [], []>} : vector<32x5xf32>, vector<5x512xf32>, vector<32x512xf32> -> vector<32x512xf32>
    %20 = arith.addf %16, %19 : vector<32x512xf32>
    %c0_20 = arith.constant 0 : index
    %c0_21 = arith.constant 0 : index
    %21 = vector.load %arg11[%c0_20, %c0_21] : memref<1x512xf32, #tpu.memory_space<vmem>>, vector<1x512xf32>
    %22 = vector.broadcast %21 : vector<1x512xf32> to vector<32x512xf32>
    %23 = arith.addf %20, %22 : vector<32x512xf32>
    %c0_22 = arith.constant 0 : index
    %c0_23 = arith.constant 0 : index
    %24 = vector.load %arg18[%c0_22, %c0_23] : memref<32x512xf32, #tpu.memory_space<vmem>>, vector<32x512xf32>
    tpu.vector_store %arg18[%c0_22, %c0_23], %23 {strides = array<i32>} : memref<32x512xf32, #tpu.memory_space<vmem>>, vector<32x512xf32>,
    %c0_24 = arith.constant 0 : index
    %c0_25 = arith.constant 0 : index
    %25 = vector.load %arg12[%c0_24, %c0_25] : memref<128x512xf32, #tpu.memory_space<vmem>>, vector<128x512xf32>
    %c0_26 = arith.constant 0 : index
    %c0_27 = arith.constant 0 : index
    %26 = vector.load %arg3[%c0_26, %c0_27] : memref<8x128xf32, #tpu.memory_space<vmem>>, vector<8x128xf32>
    %c0_28 = arith.constant 0 : index
    %c0_29 = arith.constant 0 : index
    %27 = vector.load %arg4[%c0_28, %c0_29] : memref<8x128xf32, #tpu.memory_space<vmem>>, vector<8x128xf32>
    %c0_i32 = arith.constant 0 : i32
    %c8_i32 = arith.constant 8 : i32
    %28 = arith.muli %c0_i32, %c8_i32 : i32
    %29 = tpu.assume_multiple %28, 8 : i32
    %30 = arith.index_cast %29 : i32 to index
    %c0_30 = arith.constant 0 : index
    %31 = vector.load %arg18[%30, %c0_30] : memref<32x512xf32, #tpu.memory_space<vmem>>, vector<8x512xf32>
    %cst_31 = arith.constant dense<0.000000e+00> : vector<8x512xf32>
    %32 = tpu.matmul %26, %25, %cst_31 {dimension_numbers = #tpu.dot_dimension_numbers<[1], [0], [0], [1], [0, 0, 1, 1], [], []>} : vector<8x128xf32>, vector<128x512xf32>, vector<8x512xf32> -> vector<8x512xf32>
    %33 = arith.addf %31, %32 : vector<8x512xf32>
    %34 = vector.extract_strided_slice %33 {offsets = [0, 0], sizes = [8, 128], strides = [1, 1]} : vector<8x512xf32> to vector<8x128xf32>
    %cst_32 = arith.constant 5.000000e-01 : f32
    %35 = vector.broadcast %cst_32 : f32 to vector<8x128xf32>
    %36 = arith.mulf %35, %34 : vector<8x128xf32>
    %37 = math.tanh %36 : vector<8x128xf32>
    %cst_33 = arith.constant 1.000000e+00 : f32
    %38 = vector.broadcast %cst_33 : f32 to vector<8x128xf32>
    %39 = arith.addf %37, %38 : vector<8x128xf32>
    %cst_34 = arith.constant 5.000000e-01 : f32
    %40 = vector.broadcast %cst_34 : f32 to vector<8x128xf32>
    %41 = arith.mulf %40, %39 : vector<8x128xf32>
    %42 = vector.extract_strided_slice %33 {offsets = [0, 128], sizes = [8, 128], strides = [1, 1]} : vector<8x512xf32> to vector<8x128xf32>
    %cst_35 = arith.constant 5.000000e-01 : f32
    %43 = vector.broadcast %cst_35 : f32 to vector<8x128xf32>
    %44 = arith.mulf %43, %42 : vector<8x128xf32>
    %45 = math.tanh %44 : vector<8x128xf32>
    %cst_36 = arith.constant 1.000000e+00 : f32
    %46 = vector.broadcast %cst_36 : f32 to vector<8x128xf32>
    %47 = arith.addf %45, %46 : vector<8x128xf32>
    %cst_37 = arith.constant 5.000000e-01 : f32
    %48 = vector.broadcast %cst_37 : f32 to vector<8x128xf32>
    %49 = arith.mulf %48, %47 : vector<8x128xf32>
    %50 = vector.extract_strided_slice %33 {offsets = [0, 256], sizes = [8, 128], strides = [1, 1]} : vector<8x512xf32> to vector<8x128xf32>
    %51 = math.tanh %50 : vector<8x128xf32>
    %52 = vector.extract_strided_slice %33 {offsets = [0, 384], sizes = [8, 128], strides = [1, 1]} : vector<8x512xf32> to vector<8x128xf32>
    %cst_38 = arith.constant 5.000000e-01 : f32
    %53 = vector.broadcast %cst_38 : f32 to vector<8x128xf32>
    %54 = arith.mulf %53, %52 : vector<8x128xf32>
    %55 = math.tanh %54 : vector<8x128xf32>
    %cst_39 = arith.constant 1.000000e+00 : f32
    %56 = vector.broadcast %cst_39 : f32 to vector<8x128xf32>
    %57 = arith.addf %55, %56 : vector<8x128xf32>
    %cst_40 = arith.constant 5.000000e-01 : f32
    %58 = vector.broadcast %cst_40 : f32 to vector<8x128xf32>
    %59 = arith.mulf %58, %57 : vector<8x128xf32>
    %60 = arith.mulf %49, %27 : vector<8x128xf32>
    %61 = arith.mulf %41, %51 : vector<8x128xf32>
    %62 = arith.addf %60, %61 : vector<8x128xf32>
    %63 = math.tanh %62 : vector<8x128xf32>
    %64 = arith.mulf %59, %63 : vector<8x128xf32>
    %65 = arith.index_cast %29 : i32 to index
    %c0_41 = arith.constant 0 : index
    %66 = vector.load %arg19[%65, %c0_41] : memref<32x128xf32, #tpu.memory_space<vmem>>, vector<8x128xf32>
    tpu.vector_store %arg19[%65, %c0_41], %64 {strides = array<i32>} : memref<32x128xf32, #tpu.memory_space<vmem>>, vector<8x128xf32>,
    %c1_i32 = arith.constant 1 : i32
    %c8_i32_42 = arith.constant 8 : i32
    %67 = arith.muli %c1_i32, %c8_i32_42 : i32
    %68 = tpu.assume_multiple %67, 8 : i32
    %69 = arith.index_cast %68 : i32 to index
    %c0_43 = arith.constant 0 : index
    %70 = vector.load %arg18[%69, %c0_43] : memref<32x512xf32, #tpu.memory_space<vmem>>, vector<8x512xf32>
    %cst_44 = arith.constant dense<0.000000e+00> : vector<8x512xf32>
    %71 = tpu.matmul %64, %25, %cst_44 {dimension_numbers = #tpu.dot_dimension_numbers<[1], [0], [0], [1], [0, 0, 1, 1], [], []>} : vector<8x128xf32>, vector<128x512xf32>, vector<8x512xf32> -> vector<8x512xf32>
    %72 = arith.addf %70, %71 : vector<8x512xf32>
    %73 = vector.extract_strided_slice %72 {offsets = [0, 0], sizes = [8, 128], strides = [1, 1]} : vector<8x512xf32> to vector<8x128xf32>
    %cst_45 = arith.constant 5.000000e-01 : f32
    %74 = vector.broadcast %cst_45 : f32 to vector<8x128xf32>
    %75 = arith.mulf %74, %73 : vector<8x128xf32>
    %76 = math.tanh %75 : vector<8x128xf32>
    %cst_46 = arith.constant 1.000000e+00 : f32
    %77 = vector.broadcast %cst_46 : f32 to vector<8x128xf32>
    %78 = arith.addf %76, %77 : vector<8x128xf32>
    %cst_47 = arith.constant 5.000000e-01 : f32
    %79 = vector.broadcast %cst_47 : f32 to vector<8x128xf32>
    %80 = arith.mulf %79, %78 : vector<8x128xf32>
    %81 = vector.extract_strided_slice %72 {offsets = [0, 128], sizes = [8, 128], strides = [1, 1]} : vector<8x512xf32> to vector<8x128xf32>
    %cst_48 = arith.constant 5.000000e-01 : f32
    %82 = vector.broadcast %cst_48 : f32 to vector<8x128xf32>
    %83 = arith.mulf %82, %81 : vector<8x128xf32>
    %84 = math.tanh %83 : vector<8x128xf32>
    %cst_49 = arith.constant 1.000000e+00 : f32
    %85 = vector.broadcast %cst_49 : f32 to vector<8x128xf32>
    %86 = arith.addf %84, %85 : vector<8x128xf32>
    %cst_50 = arith.constant 5.000000e-01 : f32
    %87 = vector.broadcast %cst_50 : f32 to vector<8x128xf32>
    %88 = arith.mulf %87, %86 : vector<8x128xf32>
    %89 = vector.extract_strided_slice %72 {offsets = [0, 256], sizes = [8, 128], strides = [1, 1]} : vector<8x512xf32> to vector<8x128xf32>
    %90 = math.tanh %89 : vector<8x128xf32>
    %91 = vector.extract_strided_slice %72 {offsets = [0, 384], sizes = [8, 128], strides = [1, 1]} : vector<8x512xf32> to vector<8x128xf32>
    %cst_51 = arith.constant 5.000000e-01 : f32
    %92 = vector.broadcast %cst_51 : f32 to vector<8x128xf32>
    %93 = arith.mulf %92, %91 : vector<8x128xf32>
    %94 = math.tanh %93 : vector<8x128xf32>
    %cst_52 = arith.constant 1.000000e+00 : f32
    %95 = vector.broadcast %cst_52 : f32 to vector<8x128xf32>
    %96 = arith.addf %94, %95 : vector<8x128xf32>
    %cst_53 = arith.constant 5.000000e-01 : f32
    %97 = vector.broadcast %cst_53 : f32 to vector<8x128xf32>
    %98 = arith.mulf %97, %96 : vector<8x128xf32>
    %99 = arith.mulf %88, %62 : vector<8x128xf32>
    %100 = arith.mulf %80, %90 : vector<8x128xf32>
    %101 = arith.addf %99, %100 : vector<8x128xf32>
    %102 = math.tanh %101 : vector<8x128xf32>
    %103 = arith.mulf %98, %102 : vector<8x128xf32>
    %104 = arith.index_cast %68 : i32 to index
    %c0_54 = arith.constant 0 : index
    %105 = vector.load %arg19[%104, %c0_54] : memref<32x128xf32, #tpu.memory_space<vmem>>, vector<8x128xf32>
    tpu.vector_store %arg19[%104, %c0_54], %103 {strides = array<i32>} : memref<32x128xf32, #tpu.memory_space<vmem>>, vector<8x128xf32>,
    %c2_i32 = arith.constant 2 : i32
    %c8_i32_55 = arith.constant 8 : i32
    %106 = arith.muli %c2_i32, %c8_i32_55 : i32
    %107 = tpu.assume_multiple %106, 8 : i32
    %108 = arith.index_cast %107 : i32 to index
    %c0_56 = arith.constant 0 : index
    %109 = vector.load %arg18[%108, %c0_56] : memref<32x512xf32, #tpu.memory_space<vmem>>, vector<8x512xf32>
    %cst_57 = arith.constant dense<0.000000e+00> : vector<8x512xf32>
    %110 = tpu.matmul %103, %25, %cst_57 {dimension_numbers = #tpu.dot_dimension_numbers<[1], [0], [0], [1], [0, 0, 1, 1], [], []>} : vector<8x128xf32>, vector<128x512xf32>, vector<8x512xf32> -> vector<8x512xf32>
    %111 = arith.addf %109, %110 : vector<8x512xf32>
    %112 = vector.extract_strided_slice %111 {offsets = [0, 0], sizes = [8, 128], strides = [1, 1]} : vector<8x512xf32> to vector<8x128xf32>
    %cst_58 = arith.constant 5.000000e-01 : f32
    %113 = vector.broadcast %cst_58 : f32 to vector<8x128xf32>
    %114 = arith.mulf %113, %112 : vector<8x128xf32>
    %115 = math.tanh %114 : vector<8x128xf32>
    %cst_59 = arith.constant 1.000000e+00 : f32
    %116 = vector.broadcast %cst_59 : f32 to vector<8x128xf32>
    %117 = arith.addf %115, %116 : vector<8x128xf32>
    %cst_60 = arith.constant 5.000000e-01 : f32
    %118 = vector.broadcast %cst_60 : f32 to vector<8x128xf32>
    %119 = arith.mulf %118, %117 : vector<8x128xf32>
    %120 = vector.extract_strided_slice %111 {offsets = [0, 128], sizes = [8, 128], strides = [1, 1]} : vector<8x512xf32> to vector<8x128xf32>
    %cst_61 = arith.constant 5.000000e-01 : f32
    %121 = vector.broadcast %cst_61 : f32 to vector<8x128xf32>
    %122 = arith.mulf %121, %120 : vector<8x128xf32>
    %123 = math.tanh %122 : vector<8x128xf32>
    %cst_62 = arith.constant 1.000000e+00 : f32
    %124 = vector.broadcast %cst_62 : f32 to vector<8x128xf32>
    %125 = arith.addf %123, %124 : vector<8x128xf32>
    %cst_63 = arith.constant 5.000000e-01 : f32
    %126 = vector.broadcast %cst_63 : f32 to vector<8x128xf32>
    %127 = arith.mulf %126, %125 : vector<8x128xf32>
    %128 = vector.extract_strided_slice %111 {offsets = [0, 256], sizes = [8, 128], strides = [1, 1]} : vector<8x512xf32> to vector<8x128xf32>
    %129 = math.tanh %128 : vector<8x128xf32>
    %130 = vector.extract_strided_slice %111 {offsets = [0, 384], sizes = [8, 128], strides = [1, 1]} : vector<8x512xf32> to vector<8x128xf32>
    %cst_64 = arith.constant 5.000000e-01 : f32
    %131 = vector.broadcast %cst_64 : f32 to vector<8x128xf32>
    %132 = arith.mulf %131, %130 : vector<8x128xf32>
    %133 = math.tanh %132 : vector<8x128xf32>
    %cst_65 = arith.constant 1.000000e+00 : f32
    %134 = vector.broadcast %cst_65 : f32 to vector<8x128xf32>
    %135 = arith.addf %133, %134 : vector<8x128xf32>
    %cst_66 = arith.constant 5.000000e-01 : f32
    %136 = vector.broadcast %cst_66 : f32 to vector<8x128xf32>
    %137 = arith.mulf %136, %135 : vector<8x128xf32>
    %138 = arith.mulf %127, %101 : vector<8x128xf32>
    %139 = arith.mulf %119, %129 : vector<8x128xf32>
    %140 = arith.addf %138, %139 : vector<8x128xf32>
    %141 = math.tanh %140 : vector<8x128xf32>
    %142 = arith.mulf %137, %141 : vector<8x128xf32>
    %143 = arith.index_cast %107 : i32 to index
    %c0_67 = arith.constant 0 : index
    %144 = vector.load %arg19[%143, %c0_67] : memref<32x128xf32, #tpu.memory_space<vmem>>, vector<8x128xf32>
    tpu.vector_store %arg19[%143, %c0_67], %142 {strides = array<i32>} : memref<32x128xf32, #tpu.memory_space<vmem>>, vector<8x128xf32>,
    %c3_i32 = arith.constant 3 : i32
    %c8_i32_68 = arith.constant 8 : i32
    %145 = arith.muli %c3_i32, %c8_i32_68 : i32
    %146 = tpu.assume_multiple %145, 8 : i32
    %147 = arith.index_cast %146 : i32 to index
    %c0_69 = arith.constant 0 : index
    %148 = vector.load %arg18[%147, %c0_69] : memref<32x512xf32, #tpu.memory_space<vmem>>, vector<8x512xf32>
    %cst_70 = arith.constant dense<0.000000e+00> : vector<8x512xf32>
    %149 = tpu.matmul %142, %25, %cst_70 {dimension_numbers = #tpu.dot_dimension_numbers<[1], [0], [0], [1], [0, 0, 1, 1], [], []>} : vector<8x128xf32>, vector<128x512xf32>, vector<8x512xf32> -> vector<8x512xf32>
    %150 = arith.addf %148, %149 : vector<8x512xf32>
    %151 = vector.extract_strided_slice %150 {offsets = [0, 0], sizes = [8, 128], strides = [1, 1]} : vector<8x512xf32> to vector<8x128xf32>
    %cst_71 = arith.constant 5.000000e-01 : f32
    %152 = vector.broadcast %cst_71 : f32 to vector<8x128xf32>
    %153 = arith.mulf %152, %151 : vector<8x128xf32>
    %154 = math.tanh %153 : vector<8x128xf32>
    %cst_72 = arith.constant 1.000000e+00 : f32
    %155 = vector.broadcast %cst_72 : f32 to vector<8x128xf32>
    %156 = arith.addf %154, %155 : vector<8x128xf32>
    %cst_73 = arith.constant 5.000000e-01 : f32
    %157 = vector.broadcast %cst_73 : f32 to vector<8x128xf32>
    %158 = arith.mulf %157, %156 : vector<8x128xf32>
    %159 = vector.extract_strided_slice %150 {offsets = [0, 128], sizes = [8, 128], strides = [1, 1]} : vector<8x512xf32> to vector<8x128xf32>
    %cst_74 = arith.constant 5.000000e-01 : f32
    %160 = vector.broadcast %cst_74 : f32 to vector<8x128xf32>
    %161 = arith.mulf %160, %159 : vector<8x128xf32>
    %162 = math.tanh %161 : vector<8x128xf32>
    %cst_75 = arith.constant 1.000000e+00 : f32
    %163 = vector.broadcast %cst_75 : f32 to vector<8x128xf32>
    %164 = arith.addf %162, %163 : vector<8x128xf32>
    %cst_76 = arith.constant 5.000000e-01 : f32
    %165 = vector.broadcast %cst_76 : f32 to vector<8x128xf32>
    %166 = arith.mulf %165, %164 : vector<8x128xf32>
    %167 = vector.extract_strided_slice %150 {offsets = [0, 256], sizes = [8, 128], strides = [1, 1]} : vector<8x512xf32> to vector<8x128xf32>
    %168 = math.tanh %167 : vector<8x128xf32>
    %169 = vector.extract_strided_slice %150 {offsets = [0, 384], sizes = [8, 128], strides = [1, 1]} : vector<8x512xf32> to vector<8x128xf32>
    %cst_77 = arith.constant 5.000000e-01 : f32
    %170 = vector.broadcast %cst_77 : f32 to vector<8x128xf32>
    %171 = arith.mulf %170, %169 : vector<8x128xf32>
    %172 = math.tanh %171 : vector<8x128xf32>
    %cst_78 = arith.constant 1.000000e+00 : f32
    %173 = vector.broadcast %cst_78 : f32 to vector<8x128xf32>
    %174 = arith.addf %172, %173 : vector<8x128xf32>
    %cst_79 = arith.constant 5.000000e-01 : f32
    %175 = vector.broadcast %cst_79 : f32 to vector<8x128xf32>
    %176 = arith.mulf %175, %174 : vector<8x128xf32>
    %177 = arith.mulf %166, %140 : vector<8x128xf32>
    %178 = arith.mulf %158, %168 : vector<8x128xf32>
    %179 = arith.addf %177, %178 : vector<8x128xf32>
    %180 = math.tanh %179 : vector<8x128xf32>
    %181 = arith.mulf %176, %180 : vector<8x128xf32>
    %182 = arith.index_cast %146 : i32 to index
    %c0_80 = arith.constant 0 : index
    %183 = vector.load %arg19[%182, %c0_80] : memref<32x128xf32, #tpu.memory_space<vmem>>, vector<8x128xf32>
    tpu.vector_store %arg19[%182, %c0_80], %181 {strides = array<i32>} : memref<32x128xf32, #tpu.memory_space<vmem>>, vector<8x128xf32>,
    %c4_i32 = arith.constant 4 : i32
    %c0_81 = arith.constant 0 : index
    %c0_82 = arith.constant 0 : index
    %184 = vector.load %arg16[%c0_81, %c0_82] : memref<8x128xf32, #tpu.memory_space<vmem>>, vector<8x128xf32>
    tpu.vector_store %arg16[%c0_81, %c0_82], %181 {strides = array<i32>} : memref<8x128xf32, #tpu.memory_space<vmem>>, vector<8x128xf32>,
    %c0_83 = arith.constant 0 : index
    %c0_84 = arith.constant 0 : index
    %185 = vector.load %arg17[%c0_83, %c0_84] : memref<8x128xf32, #tpu.memory_space<vmem>>, vector<8x128xf32>
    tpu.vector_store %arg17[%c0_83, %c0_84], %179 {strides = array<i32>} : memref<8x128xf32, #tpu.memory_space<vmem>>, vector<8x128xf32>,
    %c0_85 = arith.constant 0 : index
    %c0_86 = arith.constant 0 : index
    %186 = vector.load %arg19[%c0_85, %c0_86] : memref<32x128xf32, #tpu.memory_space<vmem>>, vector<32x128xf32>
    %c0_87 = arith.constant 0 : index
    %c0_88 = arith.constant 0 : index
    %187 = vector.load %arg13[%c0_87, %c0_88] : memref<128x128xf32, #tpu.memory_space<vmem>>, vector<128x128xf32>
    %cst_89 = arith.constant dense<0.000000e+00> : vector<32x128xf32>
    %188 = tpu.matmul %186, %187, %cst_89 {dimension_numbers = #tpu.dot_dimension_numbers<[1], [0], [0], [1], [0, 0, 1, 1], [], []>} : vector<32x128xf32>, vector<128x128xf32>, vector<32x128xf32> -> vector<32x128xf32>
    %c0_90 = arith.constant 0 : index
    %c0_91 = arith.constant 0 : index
    %189 = vector.load %arg14[%c0_90, %c0_91] : memref<1x128xf32, #tpu.memory_space<vmem>>, vector<1x128xf32>
    %190 = vector.broadcast %189 : vector<1x128xf32> to vector<32x128xf32>
    %191 = arith.addf %188, %190 : vector<32x128xf32>
    %c0_92 = arith.constant 0 : index
    %c0_93 = arith.constant 0 : index
    %192 = vector.load %arg15[%c0_92, %c0_93] : memref<32x128xf32, #tpu.memory_space<vmem>>, vector<32x128xf32>
    tpu.vector_store %arg15[%c0_92, %c0_93], %191 {strides = array<i32>} : memref<32x128xf32, #tpu.memory_space<vmem>>, vector<32x128xf32>,
    return
  }
  func.func @transform_0(%arg0: i32) -> (i32, i32) {
    %c0_i32 = arith.constant 0 : i32
    %c0_i32_0 = arith.constant 0 : i32
    %c0_i32_1 = arith.constant 0 : i32
    return %c0_i32, %c0_i32_0 : i32, i32
  }
  func.func @transform_1(%arg0: i32) -> (i32, i32) {
    %c0_i32 = arith.constant 0 : i32
    %c0_i32_0 = arith.constant 0 : i32
    %c0_i32_1 = arith.constant 0 : i32
    return %c0_i32, %c0_i32_0 : i32, i32
  }
  func.func @transform_2(%arg0: i32) -> (i32, i32) {
    %c0_i32 = arith.constant 0 : i32
    %c0_i32_0 = arith.constant 0 : i32
    %c0_i32_1 = arith.constant 0 : i32
    return %c0_i32, %c0_i32_0 : i32, i32
  }
  func.func @transform_3(%arg0: i32) -> (i32, i32) {
    %c0_i32 = arith.constant 0 : i32
    %c0_i32_0 = arith.constant 0 : i32
    %c0_i32_1 = arith.constant 0 : i32
    return %c0_i32, %c0_i32_0 : i32, i32
  }
  func.func @transform_4(%arg0: i32) -> (i32, i32) {
    %c0_i32 = arith.constant 0 : i32
    %c0_i32_0 = arith.constant 0 : i32
    %c0_i32_1 = arith.constant 0 : i32
    return %c0_i32, %c0_i32_0 : i32, i32
  }
  func.func @transform_5(%arg0: i32) -> (i32, i32) {
    %c0_i32 = arith.constant 0 : i32
    %c0_i32_0 = arith.constant 0 : i32
    %c0_i32_1 = arith.constant 0 : i32
    return %c0_i32, %c0_i32_0 : i32, i32
  }
  func.func @transform_6(%arg0: i32) -> (i32, i32) {
    %c0_i32 = arith.constant 0 : i32
    %c0_i32_0 = arith.constant 0 : i32
    %c0_i32_1 = arith.constant 0 : i32
    return %c0_i32, %c0_i32_0 : i32, i32
  }
  func.func @transform_7(%arg0: i32) -> (i32, i32) {
    %c0_i32 = arith.constant 0 : i32
    %c0_i32_0 = arith.constant 0 : i32
    %c0_i32_1 = arith.constant 0 : i32
    return %c0_i32, %c0_i32_0 : i32, i32
  }
  func.func @transform_8(%arg0: i32) -> (i32, i32) {
    %c0_i32 = arith.constant 0 : i32
    %c0_i32_0 = arith.constant 0 : i32
    %c0_i32_1 = arith.constant 0 : i32
    return %c0_i32, %c0_i32_0 : i32, i32
  }
  func.func @transform_9(%arg0: i32) -> (i32, i32) {
    %c0_i32 = arith.constant 0 : i32
    %c0_i32_0 = arith.constant 0 : i32
    %c0_i32_1 = arith.constant 0 : i32
    return %c0_i32, %c0_i32_0 : i32, i32
  }
  func.func @transform_10(%arg0: i32) -> (i32, i32) {
    %c0_i32 = arith.constant 0 : i32
    %c0_i32_0 = arith.constant 0 : i32
    %c0_i32_1 = arith.constant 0 : i32
    return %c0_i32, %c0_i32_0 : i32, i32
  }
  func.func @transform_11(%arg0: i32) -> (i32, i32) {
    %c0_i32 = arith.constant 0 : i32
    %c0_i32_0 = arith.constant 0 : i32
    %c0_i32_1 = arith.constant 0 : i32
    return %c0_i32, %c0_i32_0 : i32, i32
  }
  func.func @transform_12(%arg0: i32) -> (i32, i32) {
    %c0_i32 = arith.constant 0 : i32
    %c0_i32_0 = arith.constant 0 : i32
    %c0_i32_1 = arith.constant 0 : i32
    return %c0_i32, %c0_i32_0 : i32, i32
  }
  func.func @transform_13(%arg0: i32) -> (i32, i32) {
    %c0_i32 = arith.constant 0 : i32
    %c0_i32_0 = arith.constant 0 : i32
    %c0_i32_1 = arith.constant 0 : i32
    return %c0_i32, %c0_i32_0 : i32, i32
  }
  func.func @transform_14(%arg0: i32) -> (i32, i32) {
    %c0_i32 = arith.constant 0 : i32
    %c0_i32_0 = arith.constant 0 : i32
    %c0_i32_1 = arith.constant 0 : i32
    return %c0_i32, %c0_i32_0 : i32, i32
  }
  func.func @transform_15(%arg0: i32) -> (i32, i32) {
    %c0_i32 = arith.constant 0 : i32
    %c0_i32_0 = arith.constant 0 : i32
    %c0_i32_1 = arith.constant 0 : i32
    return %c0_i32, %c0_i32_0 : i32, i32
  }
  func.func @transform_16(%arg0: i32) -> (i32, i32) {
    %c0_i32 = arith.constant 0 : i32
    %c0_i32_0 = arith.constant 0 : i32
    %c0_i32_1 = arith.constant 0 : i32
    return %c0_i32, %c0_i32_0 : i32, i32
  }
}

</mosaic_0001>

<bundles_post_ra>
// kernel: tpu_custom_call.1
= control target key start
LH: loop header
LB: loop body
LE: loop exit
PB: predicated region body
PF: predicated region fallthrough
CT: control target
= control target key end

     0   :  { %s2966_s0 = inlined_call_operand.vmem [shape: f32[32,8], index: 0, kind: input, shape index: {}]   ;;  %s2967_s1 = inlined_call_operand.vmem [shape: f32[32,5], index: 1, kind: input, shape index: {}]   ;;  %s2968_s2 = inlined_call_operand.vmem [shape: f32[8,128], index: 2, kind: input, shape index: {}]   ;;  %s2969_s3 = inlined_call_operand.vmem [shape: f32[8,128], index: 3, kind: input, shape index: {}]   ;;  %s2970_s4 = inlined_call_operand.vmem [shape: f32[8,32], index: 4, kind: input, shape index: {}]   ;;  %s2971_s5 = inlined_call_operand.vmem [shape: f32[1,32], index: 5, kind: input, shape index: {}]   ;;  %s2972_s6 = inlined_call_operand.vmem [shape: f32[32,32], index: 6, kind: input, shape index: {}]   ;;  %s2973_s7 = inlined_call_operand.vmem [shape: f32[1,32], index: 7, kind: input, shape index: {}]   ;;  %s2974_s8 = inlined_call_operand.hbm [shape: f32[32,512], index: 8, kind: input, shape index: {}]   ;;  %s2975_s9 = inlined_call_operand.vmem [shape: f32[5,512], index: 9, kind: input, shape index: {}]   ;;  %s2976_s10 = inlined_call_operand.vmem [shape: f32[1,512], index: 10, kind: input, shape index: {}]   ;;  %s2977_s11 = inlined_call_operand.hbm [shape: f32[128,512], index: 11, kind: input, shape index: {}]   ;;  %s2978_s12 = inlined_call_operand.hbm [shape: f32[128,128], index: 12, kind: input, shape index: {}]   ;;  %s2979_s13 = inlined_call_operand.vmem [shape: f32[1,128], index: 13, kind: input, shape index: {}]   ;;  %s2980_s14 = inlined_call_operand.hbm [shape: f32[32,128], index: 14, kind: output, shape index: {0}]   ;;  %s2981_s15 = inlined_call_operand.hbm [shape: f32[8,128], index: 15, kind: output, shape index: {1}]   ;;  %s2982_s16 = inlined_call_operand.hbm [shape: f32[8,128], index: 16, kind: output, shape index: {2}]  }
   0x1   :  { %2984 = sst [smem:[#allocation18_spill]] %s2966_s0 }
   0x2   :  { %22 = vsyncpa [#allocation5], 0 }
   0x3   :  { %23 = vsyncpa [#allocation8], 0 }
   0x4   :  { %24 = vsyncpa [#allocation6], 0 }
   0x5   :  { %25 = vsyncpa [#allocation12], 0  ;;  %s2390_s21 = smov [#allocation7]   ;;  %s2391_s23 = smov [#allocation4]  }
   0x6   :  { %s63_s22 = sshll.u32 %s2390_s21, 4  ;;  %s47_s24 = sshll.u32 %s2391_s23, 4  ;;  %s64_s22 = int_to_ptr.vmem [resolvable:$true] %s63_s22  ;;  %s2486_s24 = int_to_ptr.vmem [resolvable:$true] %s47_s24 }
   0x7   :  { %s2250_s27 = scalar_lea.hbm %s2977_s11, 8192 }
   0x8   :  { %p2251_p0 = scmp.ne.s32.totalorder %s2977_s11, %s2250_s27  ;;  %p2254_p1 = scmp.lt.u32.totalorder %s2250_s27, %s2977_s11 }
   0xa   :  { %p2256_p2 = pnand %p2254_p1, %p2251_p0 }
   0xc   :  { %2259 = shalt.err (!%p2256_p2)
}
   0xd   :  { %s2260_s17 = scalar_lea.vmem %s64_s22, 8192  ;;  %p2265_p4 = scmp.lt.s32.totalorder %s64_s22, %s64_s22 }
   0xe   :  { %p2261_p3 = scmp.ne.s32.totalorder %s64_s22, %s2260_s17  ;;  %p2266_p5 = scmp.lt.s32.totalorder %s2260_s17, %s2260_s17 }
  0x10   :  { %p2267_p6 = por %p2266_p5, %p2265_p4 }
  0x12   :  { %p2268_p7 = pnand %p2267_p6, %p2261_p3 }
  0x14   :  { %2271 = shalt.err (!%p2268_p7)
}
  0x15   :  { %s2392_s18 = smov 512   ;;  %s2393_s19 = smov 32  }
  0x16   :  { %69 = dma.hbm_to_vmem [thread:$0]  %s2977_s11, 8192, %s64_s22, [#allocation8], %s2392_s18, %s2392_s18, %s2393_s19  }
  0x17   :  { %s2272_s26 = scalar_lea.hbm %s2974_s8, 2048 }
  0x18   :  { %p2273_p8 = scmp.ne.s32.totalorder %s2974_s8, %s2272_s26  ;;  %p2276_p9 = scmp.lt.u32.totalorder %s2272_s26, %s2974_s8 }
  0x1a   :  { %p2278_p10 = pnand %p2276_p9, %p2273_p8 }
  0x1c   :  { %2281 = shalt.err (!%p2278_p10)
}
  0x1d   :  { %s2282_s0 = scalar_lea.vmem %s2486_s24, 2048  ;;  %p2287_p12 = scmp.lt.s32.totalorder %s2486_s24, %s2486_s24 }
  0x1e   :  { %p2283_p11 = scmp.ne.s32.totalorder %s2486_s24, %s2282_s0  ;;  %p2288_p13 = scmp.lt.s32.totalorder %s2282_s0, %s2282_s0 }
  0x20   :  { %p2289_p0 = por %p2288_p13, %p2287_p12 }
  0x22   :  { %p2290_p1 = pnand %p2289_p0, %p2283_p11 }
  0x24   :  { %2293 = shalt.err (!%p2290_p1)
}
  0x25   :  { %53 = dma.hbm_to_vmem [thread:$0]  %s2974_s8, 2048, %s2486_s24, [#allocation5], %s2392_s18, %s2392_s18, %s2393_s19  }
  0x26   :  { %s2394_s17 = smov [#allocation9]   ;;  %s2294_s25 = scalar_lea.hbm %s2978_s12, 2048 }
  0x27   :  { %s75_s20 = sshll.u32 %s2394_s17, 4  ;;  %p2295_p2 = scmp.ne.s32.totalorder %s2978_s12, %s2294_s25  ;;  %s76_s20 = int_to_ptr.vmem [resolvable:$true] %s75_s20 }
  0x28   :  { %p2298_p3 = scmp.lt.u32.totalorder %s2294_s25, %s2978_s12 }
  0x2a   :  { %p2300_p4 = pnand %p2298_p3, %p2295_p2 }
  0x2c   :  { %2303 = shalt.err (!%p2300_p4)
}
  0x2d   :  { %s2304_s30 = scalar_lea.vmem %s76_s20, 2048  ;;  %p2309_p6 = scmp.lt.s32.totalorder %s76_s20, %s76_s20 }
  0x2e   :  { %p2305_p5 = scmp.ne.s32.totalorder %s76_s20, %s2304_s30  ;;  %p2310_p7 = scmp.lt.s32.totalorder %s2304_s30, %s2304_s30 }
  0x30   :  { %p2311_p8 = por %p2310_p7, %p2309_p6 }
  0x32   :  { %p2312_p9 = pnand %p2311_p8, %p2305_p5 }
  0x34   :  { %2315 = shalt.err (!%p2312_p9)
}
  0x35   :  { %s2395_s8 = smov 128   ;;  %s2396_s24 = smov 8  }
  0x36   :  { %81 = dma.hbm_to_vmem [thread:$0]  %s2978_s12, 2048, %s76_s20, [#allocation8], %s2395_s8, %s2395_s8, %s2396_s24  }
  0x37   :  { %2382 = dma.done.wait [#allocation5], 2048  }
  0x38   :  { %2383 = vsyncadd [#allocation5], 4294965248 }
  0x39   :  { %2384 = dma.done.wait [#allocation8], 10240  }
  0x3a   :  { %2385 = vsyncadd [#allocation8], 4294957056  ;;  %vm105_vm0 = vcmask 64512   ;;  %v97_v0 = vld [vmem:[%s2970_s4] sm:$0xff]  ;;  %s2985_s21 = sld [smem:[#allocation18_spill]]  ;;  %v208_v5 = vld [vmem:[%s2972_s6 + $0x8] sm:$0xff] }
  0x3b   :  { %1779 = vmatprep.subr.mxu0 %v97_v0  ;;  %v207_v4 = vld [vmem:[%s2972_s6] sm:$0xff]  ;;  %v209_v8 = vld [vmem:[%s2972_s6 + $0x10] sm:$0xff]  ;;  %v210_v9 = vld [vmem:[%s2972_s6 + $0x18] sm:$0xff]  ;;  %vm357_vm1 = vcmask 1044480   ;;  %v2397_v12 = vmov 0.0   ;;  %vm218_vm2 = vcmask 261120  }
  0x3c   :  { %1780 = vmatpush3.msra.mxu0 %v97_v0  ;;  %v1839_v6 = vpack.c.bf16 %v208_v5, %v207_v4  ;;  %v1843_v10 = vpack.c.bf16 %v210_v9, %v209_v8  ;;  %v341_v11 = vld [vmem:[%s2975_s9 + $0x8] sm:$0x1f]  ;;  %v321_v13 = vld [vmem:[#allocation4 + $0x8] sm:$0xff]  ;;  %v1715_v19 = vld [vmem:[%s2971_s5] ss:$0 sm:$0xff]  ;;  %vm344_vm3 = vcmask 39936  }
  0x3d   :  { %v325_v14 = vld [vmem:[#allocation4 + $0x28] sm:$0xff]  ;;  %v320_v16 = vld [vmem:[#allocation4] sm:$0xff]  ;;  %v340_v29 = vld [vmem:[%s2975_s9] sm:$0x1f] }
  0x3e   :  { %1840 = vmatprep.subr.bf16.mxu1 %v1839_v6  ;;  %v1847_v15 = vpack.c.bf16 %v325_v14, %v321_v13  ;;  %v324_v17 = vld [vmem:[#allocation4 + $0x20] sm:$0xff]  ;;  %v343_v31 = vld [vmem:[%s2975_s9 + $0x18] sm:$0x1f]  ;;  %v323_v34 = vld [vmem:[#allocation4 + $0x18] sm:$0xff] }
  0x3f   :  { %1842 = vmatpush3.bf16.msra.mxu1 %v1839_v6  ;;  %v1849_v18 = vpack.c.bf16 %v324_v17, %v320_v16  ;;  %v327_v35 = vld [vmem:[#allocation4 + $0x38] sm:$0xff]  ;;  %v342_v37 = vld [vmem:[%s2975_s9 + $0x10] sm:$0x1f]  ;;  %v337_v39 = vld [vmem:[%s2967_s1 + $0x8] sm:$0xff] }
  0x40   :  { %v93_v1 = vld [vmem:[%s2985_s21] sm:$0xff]  ;;  %v94_v2 = vld [vmem:[%s2985_s21 + $0x8] sm:$0xff]  ;;  %v95_v3 = vld [vmem:[%s2985_s21 + $0x10] sm:$0xff]  ;;  %1844 = vmatprep.subr.bf16.mxu1 %v1843_v10  ;;  %1848 = vmatprep.subr.bf16.mxu0 %v1847_v15  ;;  %v1855_v38 = vpack.c.bf16 %v327_v35, %v323_v34 }
  0x41   :  { %1781 = vmatprep.mubr.msk.f32.mxu0 %vm105_vm0, %v93_v1  ;;  %v96_v7 = vld [vmem:[%s2985_s21 + $0x18] sm:$0xff]  ;;  %v336_v36 = vld [vmem:[%s2967_s1] sm:$0xff]  ;;  %v338_v40 = vld [vmem:[%s2967_s1 + $0x10] sm:$0xff]  ;;  %v740_v1 = vlaneseq  ;;  %s2398_s21 = smov [#allocation11]  }
  0x42   :  { %1782 = vmatmul.mubr.msk.f32.vlgmr.msra.gmra.mrb[0].mxu0 %vm105_vm0, %v94_v2  ;;  %v339_v41 = vld [vmem:[%s2967_s1 + $0x18] sm:$0xff]  ;;  %v329_v45 = vld [vmem:[#allocation4 + $0x48] sm:$0xff]  ;;  %v331_v47 = vld [vmem:[#allocation4 + $0x58] sm:$0xff]  ;;  %s1685_s23 = sshll.u32 %s2398_s21, 4  ;;  %s1686_s23 = int_to_ptr.vmem [resolvable:$true] %s1685_s23 }
  0x43   :  { %1784 = vmatprep.mubr.msk.f32.mxu0 %vm105_vm0, %v95_v3  ;;  %1846 = vmatpush3.bf16.msra.mxu1 %v1843_v10  ;;  %v322_v42 = vld [vmem:[#allocation4 + $0x10] sm:$0xff]  ;;  %v333_v46 = vld [vmem:[#allocation4 + $0x68] sm:$0xff]  ;;  %v335_v49 = vld [vmem:[#allocation4 + $0x78] sm:$0xff]  ;;  %v2629_v17 = vshrl.u32 %v740_v1, 7  ;;  %s2316_s25 = scalar_lea.vmem %s1686_s23, 128  ;;  %p2321_p11 = scmp.lt.s32.totalorder %s1686_s23, %s1686_s23 }
  0x44   :  { %1725 = vmatprep.subr.msk.mxu1 %vm357_vm1, %v341_v11  ;;  %1850 = vmatpush1.bf16.msra.mxu0 %v1849_v18  ;;  %v326_v43 = vld [vmem:[#allocation4 + $0x30] sm:$0xff]  ;;  %v1851_v48 = vpack.c.bf16 %v333_v46, %v329_v45  ;;  %v328_v50 = vld [vmem:[#allocation4 + $0x40] sm:$0xff]  ;;  %v1859_v52 = vpack.c.bf16 %v335_v49, %v331_v47  ;;  %v793_v57 = vld [vmem:[#allocation7 + $0x8] sm:$0xff]  ;;  %p2317_p10 = scmp.ne.s32.totalorder %s1686_s23, %s2316_s25  ;;  %p2322_p12 = scmp.lt.s32.totalorder %s2316_s25, %s2316_s25 }
  0x45   :  { %v1857_v44 = vpack.c.bf16 %v326_v43, %v322_v42  ;;  %v332_v51 = vld [vmem:[#allocation4 + $0x60] sm:$0xff]  ;;  %v330_v54 = vld [vmem:[#allocation4 + $0x50] sm:$0xff]  ;;  %v797_v58 = vld [vmem:[#allocation7 + $0x28] sm:$0xff] }
  0x46   :  { %1785 = vmatmul.mubr.msk.f32.gmra.mrb[2].mxu0 %vm105_vm0, %v96_v7  ;;  %v1853_v53 = vpack.c.bf16 %v332_v51, %v328_v50  ;;  %v334_v55 = vld [vmem:[#allocation4 + $0x70] sm:$0xff]  ;;  %1852 = vmatprep.subr.bf16.mxu0 %v1851_v48  ;;  %v795_v59 = vld [vmem:[#allocation7 + $0x18] sm:$0xff]  ;;  %v2616_v60 = vpack.c.bf16 %v797_v58, %v793_v57  ;;  %v792_v0 = vld [vmem:[#allocation7] sm:$0xff]  ;;  %p2323_p13 = por %p2322_p12, %p2321_p11 }
  0x47   :  { %624 = vmatprep.mubr.f32.mxu0 %v2397_v12  ;;  %v1861_v56 = vpack.c.bf16 %v334_v55, %v330_v54  ;;  %v799_v61 = vld [vmem:[#allocation7 + $0x38] sm:$0xff]  ;;  %v796_v3 = vld [vmem:[#allocation7 + $0x20] sm:$0xff]  ;;  %v794_v4 = vld [vmem:[#allocation7 + $0x10] sm:$0xff] }
  0x48   :  { %1854 = vmatpush1.bf16.msra.mxu0 %v1853_v53  ;;  %v2618_v62 = vpack.c.bf16 %v799_v61, %v795_v59  ;;  %v1720_v63 = vld [vmem:[%s2973_s7] ss:$0 sm:$0xff]  ;;  %v798_v5 = vld [vmem:[#allocation7 + $0x30] sm:$0xff]  ;;  %v801_v7 = vld [vmem:[#allocation7 + $0x48] sm:$0xff]  ;;  %v2625_v13 = vpack.c.bf16 %v796_v3, %v792_v0  ;;  %p2324_p0 = pnand %p2323_p13, %p2317_p10 }
  0x49   :  { %1864 = vmatprep.subr.bf16.mxu0 %v2616_v60  ;;  %v805_v9 = vld [vmem:[#allocation7 + $0x68] sm:$0xff]  ;;  %v803_v10 = vld [vmem:[#allocation7 + $0x58] sm:$0xff]  ;;  %v2627_v14 = vpack.c.bf16 %v798_v5, %v794_v4  ;;  %v800_v15 = vld [vmem:[#allocation7 + $0x40] sm:$0xff] }
  0x4a   :  { %v807_v11 = vld [vmem:[#allocation7 + $0x78] sm:$0xff]  ;;  %v804_v16 = vld [vmem:[#allocation7 + $0x60] sm:$0xff]  ;;  %v810_v35 = vld [vmem:[#allocation7 + $0x90] sm:$0xff] }
  0x4b   :  { %v812_v34 = vld [vmem:[#allocation7 + $0xa0] sm:$0xff]  ;;  %v2655_v43 = vld [vmem:[%s2976_s10] sm:$0xf]  ;;  %v821_v45 = vld [vmem:[#allocation7 + $0xe8] sm:$0xff] }
  0x4c   :  { %v819_v46 = vld [vmem:[#allocation7 + $0xd8] sm:$0xff]  ;;  %v816_v53 = vld [vmem:[#allocation7 + $0xc0] sm:$0xff]  ;;  %v818_v58 = vld [vmem:[#allocation7 + $0xd0] sm:$0xff] }
  0x4d   :  { %v823_v47 = vld [vmem:[#allocation7 + $0xf8] sm:$0xff]  ;;  %v820_v54 = vld [vmem:[#allocation7 + $0xe0] sm:$0xff]  ;;  %v822_v59 = vld [vmem:[#allocation7 + $0xf0] sm:$0xff] }
  0x4e   :  { %v2677_v57 = vpack.c.bf16 %v823_v47, %v819_v46  ;;  %v825_v61 = vld [vmem:[#allocation7 + $0x108] sm:$0xff]  ;;  %v831_v3 = vld [vmem:[#allocation7 + $0x138] sm:$0xff] }
  0x4f   :  { %v829_v1 = vld [vmem:[#allocation7 + $0x128] sm:$0xff]  ;;  %v843_v47 = vld [vmem:[#allocation7 + $0x198] sm:$0xff] }
  0x50   :  { %v845_v46 = vld [vmem:[#allocation7 + $0x1a8] sm:$0xff] }
 0x115   :  { %v1783_v20 = vpop.f32.mrb[0].mxu0 }
 0x116   :  { %v190_v21 = vadd.f32 %v1783_v20, %v1715_v19  ;;  %v184_v22 = vpop.f32.mrb[1].mxu0  ;;  %v802_v20 = vld [vmem:[#allocation7 + $0x50] sm:$0xff] }
 0x117   :  { %v185_v23 = vadd.f32 %v1715_v19, %v184_v22  ;;  %v809_v22 = vld [vmem:[#allocation7 + $0x88] sm:$0xff] }
 0x118   :  { %v204_v26 = vmax.f32 %v190_v21, 0.0  ;;  %v806_v21 = vld [vmem:[#allocation7 + $0x70] sm:$0xff] }
 0x119   :  { %v203_v24 = vmax.f32 %v185_v23, 0.0  ;;  %v1786_v25 = vpop.f32.mrb[2].mxu0 }
 0x11a   :  { %v200_v27 = vadd.f32 %v1786_v25, %v1715_v19  ;;  %v194_v28 = vpop.f32.mrb[3].mxu0  ;;  %v2633_v25 = vpack.c.bf16 %v807_v11, %v803_v10  ;;  %v824_v10 = vld [vmem:[#allocation7 + $0x100] sm:$0xff] }
 0x11b   :  { %1795 = vmatprep.mubr.msk.f32.mxu1 %vm218_vm2, %v203_v24  ;;  %v195_v30 = vadd.f32 %v1715_v19, %v194_v28  ;;  %v2631_v24 = vpack.c.bf16 %v805_v9, %v801_v7  ;;  %v815_v28 = vld [vmem:[#allocation7 + $0xb8] sm:$0xff]  ;;  %v2696_v9 = vpack.c.bf16 %v822_v59, %v818_v58  ;;  %v828_v11 = vld [vmem:[#allocation7 + $0x120] sm:$0xff] }
 0x11c   :  { %1796 = vmatmul.mubr.msk.f32.vlgmr.msra.gmra.mrb[0].mxu1 %vm218_vm2, %v204_v26  ;;  %v206_v32 = vmax.f32 %v200_v27, 0.0  ;;  %v813_v26 = vld [vmem:[#allocation7 + $0xa8] sm:$0xff]  ;;  %v811_v27 = vld [vmem:[#allocation7 + $0x98] sm:$0xff] }
 0x11d   :  { %v205_v33 = vmax.f32 %v195_v30, 0.0  ;;  %1726 = vmatpush1.msk.msra.mxu1 %vm357_vm1, %v340_v29  ;;  %v808_v30 = vld [vmem:[#allocation7 + $0x80] sm:$0xff] }
 0x11e   :  { %1731 = vmatprep.subr.msk.mxu1 %vm357_vm1, %v343_v31  ;;  %v2666_v51 = vpack.c.bf16 %v812_v34, %v808_v30  ;;  %v2716_v30 = vpack.c.bf16 %v828_v11, %v824_v10  ;;  %v832_v34 = vld [vmem:[#allocation7 + $0x140] sm:$0xff]  ;;  %v853_v10 = vld [vmem:[#allocation7 + $0x1e8] sm:$0xff]  ;;  %v851_v11 = vld [vmem:[#allocation7 + $0x1d8] sm:$0xff] }
 0x11f   :  { %1798 = vmatprep.mubr.msk.f32.mxu1 %vm218_vm2, %v205_v33  ;;  %v2641_v33 = vpack.c.bf16 %v806_v21, %v802_v20  ;;  %v833_v20 = vld [vmem:[#allocation7 + $0x148] sm:$0xff] }
 0x120   :  { %1799 = vmatmul.mubr.msk.f32.gmra.mrb[2].mxu1 %vm218_vm2, %v206_v32  ;;  %v2639_v32 = vpack.c.bf16 %v804_v16, %v800_v15  ;;  %v2700_v15 = vpack.c.bf16 %v829_v1, %v825_v61  ;;  %v840_v61 = vld [vmem:[#allocation7 + $0x180] sm:$0xff] }
 0x121   :  { %434 = vmatprep.mubr.f32.mxu1 %v2397_v12 }
 0x124   :  { %1727 = vmatmul.mubr.msk.f32.vlgmr.msra.gmra.mrb[4].mxu1 %vm344_vm3, %v336_v36 }
 0x125   :  { %440 = vmatprep.mubr.f32.mxu1 %v2397_v12  ;;  %1732 = vmatpush1.msk.msra.mxu1 %vm357_vm1, %v342_v37  ;;  %v742_v37 = vsub.s32 0, %v2629_v17 }
 0x126   :  { %1856 = vmatprep.subr.bf16.mxu1 %v1855_v38 }
 0x127   :  { %v2671_v55 = vrot.slane %v2655_v43, %v742_v37 }
 0x128   :  { %1728 = vmatmul.mubr.msk.f32.gmra.mrb[6].mxu1 %vm344_vm3, %v337_v39 }
 0x129   :  { %446 = vmatprep.mubr.f32.mxu1 %v2397_v12 }
 0x12c   :  { %1729 = vmatmul.mubr.msk.f32.gmra.mrb[8].mxu1 %vm344_vm3, %v338_v40 }
 0x12d   :  { %452 = vmatprep.mubr.f32.mxu1 %v2397_v12 }
 0x130   :  { %1730 = vmatmul.mubr.msk.f32.gmra.mrb[10].mxu1 %vm344_vm3, %v339_v41 }
 0x131   :  { %523 = vmatprep.mubr.f32.mxu1 %v2397_v12 }
 0x134   :  { %1733 = vmatmul.mubr.msk.f32.vlgmr.msra.gmra.mrb[12].mxu1 %vm344_vm3, %v336_v36  ;;  %v814_v36 = vld [vmem:[#allocation7 + $0xb0] sm:$0xff] }
 0x135   :  { %529 = vmatprep.mubr.f32.mxu1 %v2397_v12  ;;  %1858 = vmatpush1.bf16.msra.mxu1 %v1857_v44  ;;  %v746_v44 = vsub.s32 1, %v2629_v17 }
 0x136   :  { %1860 = vmatprep.subr.bf16.mxu1 %v1859_v52  ;;  %v2668_v52 = vpack.c.bf16 %v814_v36, %v810_v35  ;;  %v836_v35 = vld [vmem:[#allocation7 + $0x160] sm:$0xff] }
 0x137   :  { %v2736_v58 = vpack.c.bf16 %v836_v35, %v832_v34  ;;  %v854_v34 = vld [vmem:[#allocation7 + $0x1f0] sm:$0xff] }
 0x138   :  { %1734 = vmatmul.mubr.msk.f32.gmra.mrb[14].mxu1 %vm344_vm3, %v337_v39  ;;  %v2646_v39 = vpack.c.bf16 %v813_v26, %v809_v22  ;;  %v837_v22 = vld [vmem:[#allocation7 + $0x168] sm:$0xff]  ;;  %v839_v26 = vld [vmem:[#allocation7 + $0x178] sm:$0xff] }
 0x139   :  { %535 = vmatprep.mubr.f32.mxu1 %v2397_v12  ;;  %1862 = vmatpush1.bf16.msra.mxu1 %v1861_v56  ;;  %v2722_v36 = vpack.c.bf16 %v837_v22, %v833_v20 }
 0x13a   :  { %1896 = vmatprep.subr.bf16.mxu1 %v2618_v62 }
 0x13c   :  { %1735 = vmatmul.mubr.msk.f32.gmra.mrb[16].mxu1 %vm344_vm3, %v338_v40  ;;  %v2648_v40 = vpack.c.bf16 %v815_v28, %v811_v27 }
 0x13d   :  { %541 = vmatprep.mubr.f32.mxu1 %v2397_v12 }
 0x140   :  { %1736 = vmatmul.mubr.msk.f32.gmra.mrb[18].mxu1 %vm344_vm3, %v339_v41  ;;  %v817_v41 = vld [vmem:[#allocation7 + $0xc8] sm:$0xff] }
 0x141   :  { %713 = vmatprep.mubr.f32.mxu1 %v2397_v12  ;;  %v2675_v56 = vpack.c.bf16 %v821_v45, %v817_v41  ;;  %v838_v41 = vld [vmem:[#allocation7 + $0x170] sm:$0xff] }
 0x1ef   :  { %v1797_v2 = vpop.f32.mrb[0].mxu1 }
 0x1f0   :  { %v297_v6 = vpop.f32.mrb[1].mxu1  ;;  %v303_v18 = vadd.f32 %v1797_v2, %v1720_v63  ;;  %v827_v2 = vld [vmem:[#allocation7 + $0x118] sm:$0xff] }
 0x1f1   :  { %v298_v8 = vadd.f32 %v1720_v63, %v297_v6  ;;  %v2702_v16 = vpack.c.bf16 %v831_v3, %v827_v2  ;;  %v842_v3 = vld [vmem:[#allocation7 + $0x190] sm:$0xff] }
 0x1f2   :  { %v317_v38 = vmax.f32 %v303_v18, 0.0  ;;  %v826_v18 = vld [vmem:[#allocation7 + $0x110] sm:$0xff] }
 0x1f3   :  { %v316_v19 = vmax.f32 %v298_v8, 0.0  ;;  %v1800_v23 = vpop.f32.mrb[2].mxu1  ;;  %v2694_v8 = vpack.c.bf16 %v820_v54, %v816_v53 }
 0x1f4   :  { %v307_v29 = vpop.f32.mrb[3].mxu1  ;;  %v313_v49 = vadd.f32 %v1800_v23, %v1720_v63  ;;  %v835_v23 = vld [vmem:[#allocation7 + $0x158] sm:$0xff] }
 0x1f5   :  { %1737 = vmatmul.mubr.msk.f32.vlgmr.msra.gmra.mrb[4].mxu0 %vm218_vm2, %v316_v19  ;;  %1741 = vmatmul.mubr.msk.f32.vlgmr.msra.gmra.mrb[12].mxu1 %vm218_vm2, %v316_v19  ;;  %v308_v31 = vadd.f32 %v1720_v63, %v307_v29  ;;  %v2680_v63 = vrot.slane %v2655_v43, %v746_v44  ;;  %v830_v19 = vld [vmem:[#allocation7 + $0x130] sm:$0xff]  ;;  %v2724_v37 = vpack.c.bf16 %v839_v26, %v835_v23  ;;  %v841_v44 = vld [vmem:[#allocation7 + $0x188] sm:$0xff]  ;;  %v852_v26 = vld [vmem:[#allocation7 + $0x1e0] sm:$0xff] }
 0x1f6   :  { %1866 = vmatpush1.bf16.msra.mxu0 %v2625_v13  ;;  %1898 = vmatpush1.bf16.msra.mxu1 %v2627_v14  ;;  %v319_v6 = vmax.f32 %v313_v49, 0.0  ;;  %v847_v49 = vld [vmem:[#allocation7 + $0x1b8] sm:$0xff]  ;;  %v2742_v1 = vpack.c.bf16 %v845_v46, %v841_v44  ;;  %v750_v44 = vsub.s32 2, %v2629_v17 }
 0x1f7   :  { %630 = vmatprep.mubr.f32.mxu0 %v2397_v12  ;;  %719 = vmatprep.mubr.f32.mxu1 %v2397_v12  ;;  %v2650_v42 = vpop.f32.mrb[4].mxu1  ;;  %v318_v50 = vmax.f32 %v308_v31, 0.0  ;;  %v2718_v31 = vpack.c.bf16 %v830_v19, %v826_v18  ;;  %v2744_v2 = vpack.c.bf16 %v847_v49, %v843_v47  ;;  %v855_v18 = vld [vmem:[#allocation7 + $0x1f8] sm:$0xff] }
 0x1f8   :  { %1868 = vmatprep.subr.bf16.mxu0 %v2631_v24  ;;  %1900 = vmatprep.subr.bf16.mxu1 %v2633_v25  ;;  %v2660_v48 = vpop.f32.mrb[5].mxu1  ;;  %v2756_v23 = vpack.c.bf16 %v855_v18, %v851_v11 }
 0x1f9   :  { %1738 = vmatmul.mubr.msk.f32.gmra.mrb[6].mxu0 %vm218_vm2, %v317_v38  ;;  %1742 = vmatmul.mubr.msk.f32.gmra.mrb[14].mxu1 %vm218_vm2, %v317_v38  ;;  %v834_v38 = vld [vmem:[#allocation7 + $0x150] sm:$0xff]  ;;  %v2153_v46 = vadd.f32 %v2680_v63, %v2660_v48 }
 0x1fa   :  { %1870 = vmatpush1.bf16.msra.mxu0 %v2639_v32  ;;  %1902 = vmatpush1.bf16.msra.mxu1 %v2641_v33  ;;  %v2738_v59 = vpack.c.bf16 %v838_v41, %v834_v38  ;;  %v856_v41 = vld [vmem:[%s2968_s2] sm:$0xff] }
 0x1fb   :  { %1872 = vmatprep.subr.bf16.mxu0 %v2646_v39  ;;  %1904 = vmatprep.subr.bf16.mxu1 %v2648_v40  ;;  %v442_v0 = vpop.f32.mrb[6].mxu1 }
 0x1fc   :  { %636 = vmatprep.mubr.f32.mxu0 %v2397_v12  ;;  %725 = vmatprep.mubr.f32.mxu1 %v2397_v12  ;;  %v2685_v4 = vadd.f32 %v2671_v55, %v442_v0  ;;  %v444_v5 = vpop.f32.mrb[7].mxu1  ;;  %v844_v0 = vld [vmem:[#allocation7 + $0x1a0] sm:$0xff] }
 0x1fd   :  { %1739 = vmatmul.mubr.msk.f32.gmra.mrb[8].mxu0 %vm218_vm2, %v318_v50  ;;  %1743 = vmatmul.mubr.msk.f32.gmra.mrb[16].mxu1 %vm218_vm2, %v318_v50  ;;  %v2690_v7 = vadd.f32 %v2680_v63, %v444_v5  ;;  %v846_v5 = vld [vmem:[#allocation7 + $0x1b0] sm:$0xff]  ;;  %v2748_v19 = vpack.c.bf16 %v844_v0, %v840_v61  ;;  %v2813_v61 = vrot.slane %v2655_v43, %v750_v44 }
 0x1fe   :  { %1874 = vmatpush1.bf16.msra.mxu0 %v2666_v51  ;;  %1906 = vmatpush1.bf16.msra.mxu1 %v2668_v52  ;;  %v2750_v20 = vpack.c.bf16 %v846_v5, %v842_v3  ;;  %v754_v3 = vsub.s32 3, %v2629_v17 }
 0x1ff   :  { %1876 = vmatprep.subr.bf16.mxu0 %v2675_v56  ;;  %1908 = vmatprep.subr.bf16.mxu1 %v2677_v57  ;;  %v448_v21 = vpop.f32.mrb[8].mxu1 }
 0x200   :  { %642 = vmatprep.mubr.f32.mxu0 %v2397_v12  ;;  %731 = vmatprep.mubr.f32.mxu1 %v2397_v12  ;;  %v2707_v27 = vadd.f32 %v2671_v55, %v448_v21  ;;  %v450_v28 = vpop.f32.mrb[9].mxu1  ;;  %v848_v21 = vld [vmem:[#allocation7 + $0x1c0] sm:$0xff] }
 0x201   :  { %1740 = vmatmul.mubr.msk.f32.gmra.mrb[10].mxu0 %vm218_vm2, %v319_v6  ;;  %1744 = vmatmul.mubr.msk.f32.gmra.mrb[18].mxu1 %vm218_vm2, %v319_v6  ;;  %v2712_v29 = vadd.f32 %v2680_v63, %v450_v28  ;;  %v849_v6 = vld [vmem:[#allocation7 + $0x1c8] sm:$0xff]  ;;  %v850_v28 = vld [vmem:[#allocation7 + $0x1d0] sm:$0xff]  ;;  %v2760_v35 = vpack.c.bf16 %v852_v26, %v848_v21 }
 0x202   :  { %1878 = vmatpush1.bf16.msra.mxu0 %v2694_v8  ;;  %1910 = vmatpush1.bf16.msra.mxu1 %v2696_v9  ;;  %v2754_v22 = vpack.c.bf16 %v853_v10, %v849_v6  ;;  %v2762_v38 = vpack.c.bf16 %v854_v34, %v850_v28  ;;  %v857_v34 = vld [vmem:[%s2969_s3] sm:$0xff] }
 0x203   :  { %1880 = vmatprep.subr.bf16.mxu0 %v2700_v15  ;;  %1912 = vmatprep.subr.bf16.mxu1 %v2702_v16  ;;  %v454_v45 = vpop.f32.mrb[10].mxu1 }
 0x204   :  { %929 = vmatprep.mubr.f32.mxu0 %v2397_v12  ;;  %1000 = vmatprep.mubr.f32.mxu1 %v2397_v12  ;;  %v2729_v50 = vadd.f32 %v2671_v55, %v454_v45  ;;  %v456_v53 = vpop.f32.mrb[11].mxu1  ;;  %v2151_v45 = vadd.f32 %v2671_v55, %v2650_v42  ;;  %v2818_v42 = vrot.slane %v2655_v43, %v754_v3 }
 0x205   :  { %v2732_v54 = vadd.f32 %v2680_v63, %v456_v53 }
 0x206   :  { %1882 = vmatpush1.bf16.msra.mxu0 %v2716_v30  ;;  %1914 = vmatpush1.bf16.msra.mxu1 %v2718_v31 }
 0x207   :  { %1884 = vmatprep.subr.bf16.mxu0 %v2722_v36  ;;  %1916 = vmatprep.subr.bf16.mxu1 %v2724_v37 }
 0x20a   :  { %1886 = vmatpush1.bf16.msra.mxu0 %v2736_v58  ;;  %1918 = vmatpush1.bf16.msra.mxu1 %v2738_v59 }
 0x20b   :  { %1888 = vmatprep.subr.bf16.mxu0 %v2742_v1  ;;  %1920 = vmatprep.subr.bf16.mxu1 %v2744_v2 }
 0x20e   :  { %1890 = vmatpush1.bf16.msra.mxu0 %v2748_v19  ;;  %1922 = vmatpush1.bf16.msra.mxu1 %v2750_v20 }
 0x20f   :  { %1892 = vmatprep.subr.bf16.mxu0 %v2754_v22  ;;  %1924 = vmatprep.subr.bf16.mxu1 %v2756_v23 }
 0x212   :  { %1894 = vmatpush1.bf16.msra.mxu0 %v2760_v35  ;;  %1926 = vmatpush1.bf16.msra.mxu1 %v2762_v38 }
 0x213   :  { %1928 = vmatprep.subr.bf16.mxu0 %v2616_v60  ;;  %1960 = vmatprep.subr.bf16.mxu1 %v2618_v62 }
 0x215   :  { %930 = vmatmul.mubr.f32.vlgmr.msra.gmra.mrb[4].mxu0 %v856_v41  ;;  %1001 = vmatmul.mubr.f32.vlgmr.msra.gmra.mrb[12].mxu1 %v856_v41 }
 0x216   :  { %1930 = vmatpush1.bf16.msra.mxu0 %v2625_v13  ;;  %1962 = vmatpush1.bf16.msra.mxu1 %v2627_v14 }
 0x217   :  { %1932 = vmatprep.subr.bf16.mxu0 %v2631_v24  ;;  %1964 = vmatprep.subr.bf16.mxu1 %v2633_v25 }
 0x218   :  { %1101 = vmatprep.mubr.f32.mxu0 %v2397_v12  ;;  %1172 = vmatprep.mubr.f32.mxu1 %v2397_v12 }
 0x21a   :  { %1934 = vmatpush1.bf16.msra.mxu0 %v2639_v32  ;;  %1966 = vmatpush1.bf16.msra.mxu1 %v2641_v33 }
 0x21b   :  { %1936 = vmatprep.subr.bf16.mxu0 %v2646_v39  ;;  %1968 = vmatprep.subr.bf16.mxu1 %v2648_v40 }
 0x21e   :  { %1938 = vmatpush1.bf16.msra.mxu0 %v2666_v51  ;;  %1970 = vmatpush1.bf16.msra.mxu1 %v2668_v52 }
 0x21f   :  { %1940 = vmatprep.subr.bf16.mxu0 %v2675_v56  ;;  %1972 = vmatprep.subr.bf16.mxu1 %v2677_v57 }
 0x222   :  { %1942 = vmatpush1.bf16.msra.mxu0 %v2694_v8  ;;  %1974 = vmatpush1.bf16.msra.mxu1 %v2696_v9 }
 0x223   :  { %1944 = vmatprep.subr.bf16.mxu0 %v2700_v15  ;;  %1976 = vmatprep.subr.bf16.mxu1 %v2702_v16 }
 0x226   :  { %1946 = vmatpush1.bf16.msra.mxu0 %v2716_v30  ;;  %1978 = vmatpush1.bf16.msra.mxu1 %v2718_v31 }
 0x227   :  { %1948 = vmatprep.subr.bf16.mxu0 %v2722_v36  ;;  %1980 = vmatprep.subr.bf16.mxu1 %v2724_v37 }
 0x22a   :  { %1950 = vmatpush1.bf16.msra.mxu0 %v2736_v58  ;;  %1982 = vmatpush1.bf16.msra.mxu1 %v2738_v59 }
 0x22b   :  { %1952 = vmatprep.subr.bf16.mxu0 %v2742_v1  ;;  %1984 = vmatprep.subr.bf16.mxu1 %v2744_v2 }
 0x22e   :  { %1954 = vmatpush1.bf16.msra.mxu0 %v2748_v19  ;;  %1986 = vmatpush1.bf16.msra.mxu1 %v2750_v20 }
 0x22f   :  { %1956 = vmatprep.subr.bf16.mxu0 %v2754_v22  ;;  %1988 = vmatprep.subr.bf16.mxu1 %v2756_v23 }
 0x232   :  { %1958 = vmatpush1.bf16.msra.mxu0 %v2760_v35  ;;  %1990 = vmatpush1.bf16.msra.mxu1 %v2762_v38 }
 0x233   :  { %1992 = vmatprep.subr.bf16.mxu0 %v2616_v60  ;;  %2024 = vmatprep.subr.bf16.mxu1 %v2618_v62 }
 0x2e8   :  { %v931_v47 = vpop.f32.mrb[4].mxu0  ;;  %v1002_v49 = vpop.f32.mrb[12].mxu1 }
 0x2e9   :  { %v2152_v53 = vadd.f32 %v2151_v45, %v931_v47  ;;  %v933_v0 = vpop.f32.mrb[5].mxu0  ;;  %v1004_v5 = vpop.f32.mrb[13].mxu1  ;;  %v2167_v18 = vadd.f32 %v1002_v49, %v2813_v61 }
 0x2ea   :  { %v2154_v6 = vadd.f32 %v2153_v46, %v933_v0  ;;  %v2168_v48 = vadd.f32 %v1004_v5, %v2818_v42 }
 0x2eb   :  { %v1011_v10 = vmul.f32 0.5, %v2152_v53 }
 0x2ec   :  { %v1015_v11 = vmul.f32 0.5, %v2154_v6  ;;  %v1020_v55 = vmul.f32 0.5, %v2168_v48 }
 0x2ed   :  { %2210 = vtanh.f32 %v1011_v10 }
 0x2ee   :  { %2212 = vtanh.f32 %v1015_v11 }
 0x2ef   :  { %2214 = vtanh.f32 %v2167_v18 }
 0x2f0   :  { %2216 = vtanh.f32 %v1020_v55 }
 0x2f7   :  { %v2211_v63 = vpop.eup %2210 }
 0x2f8   :  { %v2213_v21 = vpop.eup %2212  ;;  %v1013_v26 = vadd.f32 1.0, %v2211_v63 }
 0x2f9   :  { %v1017_v28 = vadd.f32 1.0, %v2213_v21  ;;  %v2215_v41 = vpop.eup %2214 }
 0x2fa   :  { %v1014_v17 = vmul.f32 0.5, %v1013_v26  ;;  %v2217_v47 = vpop.eup %2216 }
 0x2fb   :  { %v1018_v44 = vmul.f32 0.5, %v1017_v28  ;;  %v1022_v49 = vadd.f32 1.0, %v2217_v47 }
 0x2fc   :  { %v1025_v45 = vmul.f32 %v2215_v41, %v1014_v17 }
 0x2fd   :  { %v1024_v43 = vmul.f32 %v1018_v44, %v857_v34  ;;  %v1023_v53 = vmul.f32 0.5, %v1022_v49 }
 0x2ff   :  { %v2824_v46 = vadd.f32 %v1025_v45, %v1024_v43 }
 0x301   :  { %2218 = vtanh.f32 %v2824_v46 }
 0x30b   :  { %v2219_v0 = vpop.eup %2218 }
 0x30c   :  { %v2827_v3 = vmul.f32 %v2219_v0, %v1023_v53 }
 0x30e   :  { %1102 = vmatmul.mubr.f32.vlgmr.msra.gmra.mrb[6].mxu0 %v2827_v3  ;;  %1173 = vmatmul.mubr.f32.vlgmr.msra.gmra.mrb[14].mxu1 %v2827_v3 }
 0x30f   :  { %1994 = vmatpush1.bf16.msra.mxu0 %v2625_v13  ;;  %2026 = vmatpush1.bf16.msra.mxu1 %v2627_v14 }
 0x310   :  { %1996 = vmatprep.subr.bf16.mxu0 %v2631_v24  ;;  %2028 = vmatprep.subr.bf16.mxu1 %v2633_v25 }
 0x311   :  { %1274 = vmatprep.mubr.f32.mxu0 %v2397_v12  ;;  %1345 = vmatprep.mubr.f32.mxu1 %v2397_v12 }
 0x313   :  { %1998 = vmatpush1.bf16.msra.mxu0 %v2639_v32  ;;  %2030 = vmatpush1.bf16.msra.mxu1 %v2641_v33 }
 0x314   :  { %2000 = vmatprep.subr.bf16.mxu0 %v2646_v39  ;;  %2032 = vmatprep.subr.bf16.mxu1 %v2648_v40 }
 0x317   :  { %2002 = vmatpush1.bf16.msra.mxu0 %v2666_v51  ;;  %2034 = vmatpush1.bf16.msra.mxu1 %v2668_v52 }
 0x318   :  { %2004 = vmatprep.subr.bf16.mxu0 %v2675_v56  ;;  %2036 = vmatprep.subr.bf16.mxu1 %v2677_v57 }
 0x31b   :  { %2006 = vmatpush1.bf16.msra.mxu0 %v2694_v8  ;;  %2038 = vmatpush1.bf16.msra.mxu1 %v2696_v9 }
 0x31c   :  { %2008 = vmatprep.subr.bf16.mxu0 %v2700_v15  ;;  %2040 = vmatprep.subr.bf16.mxu1 %v2702_v16 }
 0x31f   :  { %2010 = vmatpush1.bf16.msra.mxu0 %v2716_v30  ;;  %2042 = vmatpush1.bf16.msra.mxu1 %v2718_v31 }
 0x320   :  { %2012 = vmatprep.subr.bf16.mxu0 %v2722_v36  ;;  %2044 = vmatprep.subr.bf16.mxu1 %v2724_v37 }
 0x323   :  { %2014 = vmatpush1.bf16.msra.mxu0 %v2736_v58  ;;  %2046 = vmatpush1.bf16.msra.mxu1 %v2738_v59 }
 0x324   :  { %2016 = vmatprep.subr.bf16.mxu0 %v2742_v1  ;;  %2048 = vmatprep.subr.bf16.mxu1 %v2744_v2 }
 0x327   :  { %2018 = vmatpush1.bf16.msra.mxu0 %v2748_v19  ;;  %2050 = vmatpush1.bf16.msra.mxu1 %v2750_v20 }
 0x328   :  { %2020 = vmatprep.subr.bf16.mxu0 %v2754_v22  ;;  %2052 = vmatprep.subr.bf16.mxu1 %v2756_v23 }
 0x32b   :  { %2022 = vmatpush1.bf16.msra.mxu0 %v2760_v35  ;;  %2054 = vmatpush1.bf16.msra.mxu1 %v2762_v38 }
 0x32c   :  { %2056 = vmatprep.subr.bf16.mxu0 %v2616_v60  ;;  %2088 = vmatprep.subr.bf16.mxu1 %v2618_v62 }
 0x3e1   :  { %v1103_v5 = vpop.f32.mrb[6].mxu0  ;;  %v1174_v6 = vpop.f32.mrb[14].mxu1 }
 0x3e2   :  { %v2156_v10 = vadd.f32 %v2685_v4, %v1103_v5  ;;  %v1105_v11 = vpop.f32.mrb[7].mxu0  ;;  %v1176_v18 = vpop.f32.mrb[15].mxu1  ;;  %v2169_v21 = vadd.f32 %v1174_v6, %v2813_v61 }
 0x3e3   :  { %v2158_v48 = vadd.f32 %v2690_v7, %v1105_v11  ;;  %v2170_v26 = vadd.f32 %v1176_v18, %v2818_v42  ;;  %v1562_v11 = vld [vmem:[#allocation9 + $0x38] sm:$0xff] }
 0x3e4   :  { %v1183_v55 = vmul.f32 0.5, %v2156_v10  ;;  %v1561_v10 = vld [vmem:[#allocation9 + $0x30] sm:$0xff] }
 0x3e5   :  { %v1187_v63 = vmul.f32 0.5, %v2158_v48  ;;  %v1192_v60 = vmul.f32 0.5, %v2170_v26  ;;  %v2131_v18 = vpack.c.bf16 %v1562_v11, %v1561_v10  ;;  %v1563_v48 = vld [vmem:[#allocation9 + $0x40] sm:$0xff]  ;;  %v1566_v26 = vld [vmem:[#allocation9 + $0x58] sm:$0xff] }
 0x3e6   :  { %2220 = vtanh.f32 %v1183_v55  ;;  %v1564_v55 = vld [vmem:[#allocation9 + $0x48] sm:$0xff] }
 0x3e7   :  { %2222 = vtanh.f32 %v1187_v63  ;;  %v2135_v63 = vpack.c.bf16 %v1564_v55, %v1563_v48 }
 0x3e8   :  { %2224 = vtanh.f32 %v2169_v21  ;;  %v1565_v21 = vld [vmem:[#allocation9 + $0x50] sm:$0xff] }
 0x3e9   :  { %2226 = vtanh.f32 %v1192_v60  ;;  %v2139_v60 = vpack.c.bf16 %v1566_v26, %v1565_v21 }
 0x3f0   :  { %v2221_v28 = vpop.eup %2220 }
 0x3f1   :  { %v2223_v62 = vpop.eup %2222  ;;  %v1185_v17 = vadd.f32 1.0, %v2221_v28  ;;  %v1567_v28 = vld [vmem:[#allocation9 + $0x60] sm:$0xff] }
 0x3f2   :  { %v1189_v34 = vadd.f32 1.0, %v2223_v62  ;;  %v2225_v41 = vpop.eup %2224  ;;  %v1568_v62 = vld [vmem:[#allocation9 + $0x68] sm:$0xff] }
 0x3f3   :  { %v1186_v4 = vmul.f32 0.5, %v1185_v17  ;;  %v2227_v47 = vpop.eup %2226  ;;  %v1569_v17 = vld [vmem:[#allocation9 + $0x70] sm:$0xff] }
 0x3f4   :  { %v1190_v44 = vmul.f32 0.5, %v1189_v34  ;;  %v1194_v49 = vadd.f32 1.0, %v2227_v47  ;;  %v1570_v34 = vld [vmem:[#allocation9 + $0x78] sm:$0xff] }
 0x3f5   :  { %v1197_v45 = vmul.f32 %v2225_v41, %v1186_v4  ;;  %v2147_v4 = vpack.c.bf16 %v1570_v34, %v1569_v17 }
 0x3f6   :  { %v1196_v7 = vmul.f32 %v1190_v44, %v2824_v46  ;;  %v1195_v53 = vmul.f32 0.5, %v1194_v49  ;;  %v1560_v46 = vld [vmem:[#allocation9 + $0x28] sm:$0xff] }
 0x3f8   :  { %v2870_v43 = vadd.f32 %v1197_v45, %v1196_v7 }
 0x3fa   :  { %2228 = vtanh.f32 %v2870_v43 }
 0x404   :  { %v2229_v0 = vpop.eup %2228 }
 0x405   :  { %v2873_v5 = vmul.f32 %v2229_v0, %v1195_v53 }
 0x407   :  { %1275 = vmatmul.mubr.f32.vlgmr.msra.gmra.mrb[8].mxu0 %v2873_v5  ;;  %1346 = vmatmul.mubr.f32.vlgmr.msra.gmra.mrb[16].mxu1 %v2873_v5 }
 0x408   :  { %2058 = vmatpush1.bf16.msra.mxu0 %v2625_v13  ;;  %2090 = vmatpush1.bf16.msra.mxu1 %v2627_v14  ;;  %v1556_v13 = vld [vmem:[#allocation9 + $0x8] sm:$0xff] }
 0x409   :  { %2060 = vmatprep.subr.bf16.mxu0 %v2631_v24  ;;  %2092 = vmatprep.subr.bf16.mxu1 %v2633_v25 }
 0x40a   :  { %1447 = vmatprep.mubr.f32.mxu0 %v2397_v12  ;;  %1518 = vmatprep.mubr.f32.mxu1 %v2397_v12  ;;  %v1555_v12 = vld [vmem:[#allocation9] sm:$0xff] }
 0x40b   :  { %v2119_v14 = vpack.c.bf16 %v1556_v13, %v1555_v12 }
 0x40c   :  { %2062 = vmatpush1.bf16.msra.mxu0 %v2639_v32  ;;  %2094 = vmatpush1.bf16.msra.mxu1 %v2641_v33 }
 0x40d   :  { %2064 = vmatprep.subr.bf16.mxu0 %v2646_v39  ;;  %2096 = vmatprep.subr.bf16.mxu1 %v2648_v40 }
 0x410   :  { %2066 = vmatpush1.bf16.msra.mxu0 %v2666_v51  ;;  %2098 = vmatpush1.bf16.msra.mxu1 %v2668_v52 }
 0x411   :  { %2068 = vmatprep.subr.bf16.mxu0 %v2675_v56  ;;  %2100 = vmatprep.subr.bf16.mxu1 %v2677_v57 }
 0x414   :  { %2070 = vmatpush1.bf16.msra.mxu0 %v2694_v8  ;;  %2102 = vmatpush1.bf16.msra.mxu1 %v2696_v9 }
 0x415   :  { %2072 = vmatprep.subr.bf16.mxu0 %v2700_v15  ;;  %2104 = vmatprep.subr.bf16.mxu1 %v2702_v16 }
 0x418   :  { %2074 = vmatpush1.bf16.msra.mxu0 %v2716_v30  ;;  %2106 = vmatpush1.bf16.msra.mxu1 %v2718_v31 }
 0x419   :  { %2076 = vmatprep.subr.bf16.mxu0 %v2722_v36  ;;  %2108 = vmatprep.subr.bf16.mxu1 %v2724_v37 }
 0x41c   :  { %2078 = vmatpush1.bf16.msra.mxu0 %v2736_v58  ;;  %2110 = vmatpush1.bf16.msra.mxu1 %v2738_v59 }
 0x41d   :  { %2080 = vmatprep.subr.bf16.mxu0 %v2742_v1  ;;  %2112 = vmatprep.subr.bf16.mxu1 %v2744_v2  ;;  %v1557_v2 = vld [vmem:[#allocation9 + $0x10] sm:$0xff] }
 0x420   :  { %2082 = vmatpush1.bf16.msra.mxu0 %v2748_v19  ;;  %2114 = vmatpush1.bf16.msra.mxu1 %v2750_v20  ;;  %v1558_v19 = vld [vmem:[#allocation9 + $0x18] sm:$0xff] }
 0x421   :  { %2084 = vmatprep.subr.bf16.mxu0 %v2754_v22  ;;  %2116 = vmatprep.subr.bf16.mxu1 %v2756_v23 }
 0x424   :  { %2086 = vmatpush1.bf16.msra.mxu0 %v2760_v35  ;;  %2118 = vmatpush1.bf16.msra.mxu1 %v2762_v38  ;;  %v2123_v35 = vpack.c.bf16 %v1558_v19, %v1557_v2  ;;  %v1559_v38 = vld [vmem:[#allocation9 + $0x20] sm:$0xff] }
 0x425   :  { %2120 = vmatprep.subr.bf16.mxu0 %v2119_v14  ;;  %v2127_v6 = vpack.c.bf16 %v1560_v46, %v1559_v38 }
 0x4da   :  { %v1276_v24 = vpop.f32.mrb[8].mxu0  ;;  %v1347_v25 = vpop.f32.mrb[16].mxu1 }
 0x4db   :  { %v2160_v32 = vadd.f32 %v2707_v27, %v1276_v24  ;;  %v1278_v33 = vpop.f32.mrb[9].mxu0  ;;  %v1349_v39 = vpop.f32.mrb[17].mxu1  ;;  %v2171_v56 = vadd.f32 %v1347_v25, %v2813_v61 }
 0x4dc   :  { %v2162_v40 = vadd.f32 %v2712_v29, %v1278_v33  ;;  %v2172_v57 = vadd.f32 %v1349_v39, %v2818_v42 }
 0x4dd   :  { %v1356_v51 = vmul.f32 0.5, %v2160_v32 }
 0x4de   :  { %v1360_v52 = vmul.f32 0.5, %v2162_v40  ;;  %v1365_v8 = vmul.f32 0.5, %v2172_v57 }
 0x4df   :  { %2230 = vtanh.f32 %v1356_v51 }
 0x4e0   :  { %2232 = vtanh.f32 %v1360_v52 }
 0x4e1   :  { %2234 = vtanh.f32 %v2171_v56 }
 0x4e2   :  { %2236 = vtanh.f32 %v1365_v8 }
 0x4e9   :  { %v2231_v9 = vpop.eup %2230 }
 0x4ea   :  { %v2233_v15 = vpop.eup %2232  ;;  %v1358_v16 = vadd.f32 1.0, %v2231_v9 }
 0x4eb   :  { %v1362_v30 = vadd.f32 1.0, %v2233_v15  ;;  %v2235_v31 = vpop.eup %2234 }
 0x4ec   :  { %v1359_v27 = vmul.f32 0.5, %v1358_v16  ;;  %v2237_v59 = vpop.eup %2236 }
 0x4ed   :  { %v1363_v36 = vmul.f32 0.5, %v1362_v30  ;;  %v1367_v1 = vadd.f32 1.0, %v2237_v59 }
 0x4ee   :  { %v1370_v37 = vmul.f32 %v2235_v31, %v1359_v27 }
 0x4ef   :  { %v1369_v29 = vmul.f32 %v1363_v36, %v2870_v43  ;;  %v1368_v20 = vmul.f32 0.5, %v1367_v1 }
 0x4f1   :  { %v2914_v58 = vadd.f32 %v1370_v37, %v1369_v29 }
 0x4f3   :  { %2238 = vtanh.f32 %v2914_v58 }
 0x4fd   :  { %v2239_v22 = vpop.eup %2238 }
 0x4fe   :  { %v1373_v23 = vmul.f32 %v2239_v22, %v1368_v20 }
 0x500   :  { %1448 = vmatmul.mubr.f32.vlgmr.msra.gmra.mrb[10].mxu0 %v1373_v23  ;;  %1519 = vmatmul.mubr.f32.vlgmr.msra.gmra.mrb[18].mxu1 %v1373_v23 }
 0x501   :  { %2122 = vmatpush3.bf16.msra.mxu0 %v2119_v14  ;;  %1833 = vmatprep.mubr.f32.mxu0 %v2827_v3  ;;  %v2143_v3 = vpack.c.bf16 %v1568_v62, %v1567_v28 }
 0x502   :  { %2124 = vmatprep.subr.bf16.mxu0 %v2123_v35 }
 0x505   :  { %2126 = vmatpush3.bf16.msra.mxu0 %v2123_v35 }
 0x506   :  { %2128 = vmatprep.subr.bf16.mxu0 %v2127_v6 }
 0x509   :  { %2130 = vmatpush3.bf16.msra.mxu0 %v2127_v6 }
 0x50a   :  { %2132 = vmatprep.subr.bf16.mxu0 %v2131_v18 }
 0x50d   :  { %2134 = vmatpush3.bf16.msra.mxu0 %v2131_v18 }
 0x50e   :  { %2136 = vmatprep.subr.bf16.mxu0 %v2135_v63 }
 0x511   :  { %2138 = vmatpush3.bf16.msra.mxu0 %v2135_v63 }
 0x512   :  { %2140 = vmatprep.subr.bf16.mxu0 %v2139_v60 }
 0x515   :  { %2142 = vmatpush3.bf16.msra.mxu0 %v2139_v60 }
 0x516   :  { %2144 = vmatprep.subr.bf16.mxu0 %v2143_v3 }
 0x519   :  { %2146 = vmatpush3.bf16.msra.mxu0 %v2143_v3 }
 0x51a   :  { %2148 = vmatprep.subr.bf16.mxu0 %v2147_v4 }
 0x51d   :  { %2150 = vmatpush3.bf16.msra.mxu0 %v2147_v4 }
 0x520   :  { %1834 = vmatmul.mubr.f32.vlgmr.msra.gmra.mrb[12].mxu0 %v2873_v5 }
 0x521   :  { %1836 = vmatprep.mubr.f32.mxu0 %v1373_v23 }
 0x5d3   :  { %v1449_v41 = vpop.f32.mrb[10].mxu0  ;;  %v1520_v44 = vpop.f32.mrb[18].mxu1 }
 0x5d4   :  { %v2164_v45 = vadd.f32 %v2729_v50, %v1449_v41  ;;  %v1451_v7 = vpop.f32.mrb[11].mxu0  ;;  %v1522_v43 = vpop.f32.mrb[19].mxu1  ;;  %v2173_v0 = vadd.f32 %v1520_v44, %v2813_v61 }
 0x5d5   :  { %v2166_v47 = vadd.f32 %v2732_v54, %v1451_v7  ;;  %v2174_v12 = vadd.f32 %v1522_v43, %v2818_v42  ;;  %v1745_v42 = vld [vmem:[%s2979_s13] ss:$0 sm:$0xff] }
 0x5d6   :  { %v1529_v49 = vmul.f32 0.5, %v2164_v45 }
 0x5d7   :  { %v1533_v53 = vmul.f32 0.5, %v2166_v47  ;;  %v1538_v13 = vmul.f32 0.5, %v2174_v12 }
 0x5d8   :  { %2240 = vtanh.f32 %v1529_v49 }
 0x5d9   :  { %2242 = vtanh.f32 %v1533_v53 }
 0x5da   :  { %2244 = vtanh.f32 %v2173_v0 }
 0x5db   :  { %2246 = vtanh.f32 %v1538_v13 }
 0x5e2   :  { %v2241_v5 = vpop.eup %2240 }
 0x5e3   :  { %v2243_v14 = vpop.eup %2242  ;;  %v1531_v24 = vadd.f32 1.0, %v2241_v5 }
 0x5e4   :  { %v1535_v25 = vadd.f32 1.0, %v2243_v14  ;;  %v2245_v32 = vpop.eup %2244 }
 0x5e5   :  { %v1532_v50 = vmul.f32 0.5, %v1531_v24  ;;  %v2247_v61 = vpop.eup %2246 }
 0x5e6   :  { %v1536_v33 = vmul.f32 0.5, %v1535_v25  ;;  %v1540_v51 = vadd.f32 1.0, %v2247_v61 }
 0x5e7   :  { %v1543_v39 = vmul.f32 %v2245_v32, %v1532_v50 }
 0x5e8   :  { %v1542_v54 = vmul.f32 %v1536_v33, %v2914_v58  ;;  %v1541_v8 = vmul.f32 0.5, %v1540_v51 }
 0x5ea   :  { %v1544_v40 = vadd.f32 %v1543_v39, %v1542_v54 }
 0x5ec   :  { %2248 = vtanh.f32 %v1544_v40  ;;  %1550 = vst [vmem:[#allocation13] sm:$0xff] %v1544_v40 }
 0x5f3   :  { %v1835_v52 = vpop.f32.mrb[12].mxu0 }
 0x5f4   :  { %v1650_v56 = vadd.f32 %v1835_v52, %v1745_v42  ;;  %v1644_v57 = vpop.f32.mrb[13].mxu0 }
 0x5f5   :  { %v1645_v9 = vadd.f32 %v1745_v42, %v1644_v57 }
 0x5f6   :  { %v2249_v15 = vpop.eup %2248  ;;  %1664 = vst [vmem:[#allocation10 + $0x8] sm:$0xff] %v1650_v56 }
 0x5f7   :  { %1663 = vst [vmem:[#allocation10] sm:$0xff] %v1645_v9  ;;  %v1546_v16 = vmul.f32 %v2249_v15, %v1541_v8 }
 0x5f9   :  { %1837 = vmatmul.mubr.f32.gmra.mrb[14].mxu0 %v1546_v16  ;;  %1549 = vst [vmem:[#allocation11] sm:$0xff] %v1546_v16 }
 0x5fa   :  { %2327 = shalt.err (!%p2324_p0)
}
 0x5fb   :  { %s2328_s20 = scalar_lea.hbm %s2981_s15, 128 }
 0x5fc   :  { %p2329_p1 = scmp.ne.s32.totalorder %s2981_s15, %s2328_s20  ;;  %p2332_p2 = scmp.lt.u32.totalorder %s2328_s20, %s2981_s15 }
 0x5fe   :  { %p2334_p3 = pnand %p2332_p2, %p2329_p1 }
 0x600   :  { %2337 = shalt.err (!%p2334_p3)
}
 0x601   :  { %1688 = dma.vmem_to_hbm [thread:$0]  %s1686_s23, 128, %s2981_s15, [#allocation12]  }
 0x602   :  { %s2399_s30 = smov [#allocation13]  }
 0x603   :  { %s1695_s18 = sshll.u32 %s2399_s30, 4  ;;  %s1696_s18 = int_to_ptr.vmem [resolvable:$true] %s1695_s18 }
 0x604   :  { %s2338_s9 = scalar_lea.vmem %s1696_s18, 128  ;;  %p2343_p5 = scmp.lt.s32.totalorder %s1696_s18, %s1696_s18 }
 0x605   :  { %p2339_p4 = scmp.ne.s32.totalorder %s1696_s18, %s2338_s9  ;;  %p2344_p6 = scmp.lt.s32.totalorder %s2338_s9, %s2338_s9 }
 0x607   :  { %p2345_p7 = por %p2344_p6, %p2343_p5 }
 0x609   :  { %p2346_p8 = pnand %p2345_p7, %p2339_p4 }
 0x60b   :  { %2349 = shalt.err (!%p2346_p8)
}
 0x60c   :  { %s2350_s0 = scalar_lea.hbm %s2982_s16, 128 }
 0x60d   :  { %p2351_p9 = scmp.ne.s32.totalorder %s2982_s16, %s2350_s0  ;;  %p2354_p10 = scmp.lt.u32.totalorder %s2350_s0, %s2982_s16 }
 0x60f   :  { %p2356_p11 = pnand %p2354_p10, %p2351_p9 }
 0x611   :  { %2359 = shalt.err (!%p2356_p11)
}
 0x612   :  { %1698 = dma.vmem_to_hbm [thread:$0]  %s1696_s18, 128, %s2982_s16, [#allocation12]  }
 0x613   :  { %s2400_s17 = smov [#allocation10]  }
 0x614   :  { %s1672_s3 = sshll.u32 %s2400_s17, 4  ;;  %s1673_s3 = int_to_ptr.vmem [resolvable:$true] %s1672_s3 }
 0x615   :  { %s2360_s6 = scalar_lea.vmem %s1673_s3, 512  ;;  %p2365_p13 = scmp.lt.s32.totalorder %s1673_s3, %s1673_s3 }
 0x616   :  { %p2361_p12 = scmp.ne.s32.totalorder %s1673_s3, %s2360_s6  ;;  %p2366_p0 = scmp.lt.s32.totalorder %s2360_s6, %s2360_s6 }
 0x618   :  { %p2367_p1 = por %p2366_p0, %p2365_p13 }
 0x61a   :  { %p2368_p2 = pnand %p2367_p1, %p2361_p12 }
 0x6cc   :  { %v1838_v30 = vpop.f32.mrb[14].mxu0 }
 0x6cd   :  { %v1660_v27 = vadd.f32 %v1838_v30, %v1745_v42  ;;  %v1654_v31 = vpop.f32.mrb[15].mxu0 }
 0x6ce   :  { %v1655_v36 = vadd.f32 %v1745_v42, %v1654_v31 }
 0x6cf   :  { %1666 = vst [vmem:[#allocation10 + $0x18] sm:$0xff] %v1660_v27 }
 0x6d0   :  { %1665 = vst [vmem:[#allocation10 + $0x10] sm:$0xff] %v1655_v36 }
 0x6d1   :  { %2371 = shalt.err (!%p2368_p2)
}
 0x6d2   :  { %s2372_s16 = scalar_lea.hbm %s2980_s14, 512 }
 0x6d3   :  { %p2373_p3 = scmp.ne.s32.totalorder %s2980_s14, %s2372_s16  ;;  %p2376_p4 = scmp.lt.u32.totalorder %s2372_s16, %s2980_s14 }
 0x6d5   :  { %p2378_p5 = pnand %p2376_p4, %p2373_p3 }
 0x6d7   :  { %2381 = shalt.err (!%p2378_p5)
}
 0x6d8   :  { %1678 = dma.vmem_to_hbm [thread:$0]  %s1673_s3, 512, %s2980_s14, [#allocation6], %s2395_s8, %s2395_s8, %s2396_s24  }
 0x6d9   :  { %2386 = dma.done.wait [#allocation6], 512  }
 0x6da   :  { %2387 = vsyncadd [#allocation6], 4294966784 }
 0x6db   :  { %2388 = dma.done.wait [#allocation12], 256  }
 0x6dc   :  { %2389 = vsyncadd [#allocation12], 4294967040 }
 0x6dd   :  { %1708 = vsyncpa [#allocation5], 1 }
 0x6de   :  { %1709 = vsyncpa [#allocation8], 1 }
 0x6df   :  { %1710 = vsyncpa [#allocation6], 1 }
 0x6e0   :  { %1711 = vsyncpa [#allocation12], 1 }

</bundles_post_ra>
